<compile_context>
chip_gen: v7x
topology: tpu7x:2x2x1
jax: 0.10.0
libtpu: 0.0.40
codegen_flags: <defaults>
</compile_context>

<pallas_src>
import functools

import jax
import jax.numpy as jnp
from jax.experimental import pallas as pl
from jax.experimental.pallas import tpu as pltpu

_LANE = 128
_SUBLANE = 8
# Above this many rows, split into >=2 row tiles so the "parallel" grid axis
# can be sharded across both TensorCores on v7x.
_MIN_SPLIT_ROWS = 512
# Keep the whole (L, D, 2D)+(L, 1, 2D) stack VMEM-resident while 2x its size
# fits this budget; otherwise stream one layer's params per grid step.
_RESIDENT_WEIGHT_BUDGET_BYTES = 16 * 1024 * 1024


def _round_up(x, m):
    return (x + m - 1) // m * m


def _pad_to(arr, shape):
    pads = [(0, t - s) for s, t in zip(arr.shape, shape)]
    return jnp.pad(arr, pads) if any(p for _, p in pads) else arr


def _highway_fused_kernel(x_ref, w_ref, b_ref, o_ref, *scratch, resident_weights):
    """Grid = (row tiles, layers).

    The running activation is carried across the sequential layer axis either
    directly in o_ref (f32 I/O; its block index is constant over the layer
    axis) or in an f32 VMEM scratch (sub-f32 I/O).
    """
    acc_ref = scratch[0] if scratch else o_ref
    d = o_ref.shape[-1]
    layer = pl.program_id(1)

    @pl.when(layer == 0)
    def _():
        acc_ref[...] = x_ref[...].astype(acc_ref.dtype)

    cur = acc_ref[...]                                  # f32 running activation
    if resident_weights:
        w = w_ref[layer]                                # (d, 2d), dynamic layer index
        bias = b_ref[layer]                             # (1, 2d)
    else:
        w = w_ref[...]                                  # squeezed to (d, 2d)
        bias = b_ref[...]                               # (1, 2d)

    # Single fused projection per layer; operands cast to the weight dtype
    # (bf16-native MXU when params are bf16) with f32 accumulation.
    # Columns [0:d) = nonlinear half, [d:2d) = gate half.
    proj = jnp.dot(cur.astype(w.dtype), w, preferred_element_type=jnp.float32)
    proj = proj + bias.astype(jnp.float32)
    nonlinear = jnp.maximum(proj[:, :d], 0.0)           # relu (VPU)
    gate = jax.nn.sigmoid(proj[:, d:])                  # sigmoid (EUP)
    # == gate*cur + (1-gate)*nonlinear, with one VPU multiply saved.
    new = nonlinear + gate * (cur - nonlinear)
    acc_ref[...] = new

    if scratch:
        @pl.when(layer == pl.num_programs(1) - 1)
        def _():
            o_ref[...] = new.astype(o_ref.dtype)
    # TODO(synk): activation is fixed to ReLU (the module default); a different
    # `activation` callable would need its own epilogue variant.


def _highway_pallas(x, w, b, *, tile_n, resident_weights, vmem_limit_bytes, cost):
    n, d = x.shape
    num_layers = w.shape[0]
    grid = (n // tile_n, num_layers)
    carry_in_out = x.dtype == jnp.float32
    scratch_shapes = [] if carry_in_out else [pltpu.VMEM((tile_n, d), jnp.float32)]

    if resident_weights:
        # Whole stack VMEM-resident: constant block index => DMA'd exactly once.
        w_spec = pl.BlockSpec((num_layers, d, 2 * d), lambda i, j: (0, 0, 0))
        b_spec = pl.BlockSpec((num_layers, 1, 2 * d), lambda i, j: (0, 0, 0))
    else:
        # Stream one layer's params per grid step (leading dim squeezed away).
        w_spec = pl.BlockSpec((pl.Squeezed(), d, 2 * d), lambda i, j: (j, 0, 0))
        b_spec = pl.BlockSpec((pl.Squeezed(), 1, 2 * d), lambda i, j: (j, 0, 0))

    kernel = functools.partial(_highway_fused_kernel,
                               resident_weights=resident_weights)
    return pl.pallas_call(
        kernel,
        out_shape=jax.ShapeDtypeStruct((n, d), x.dtype),
        grid=grid,
        in_specs=[
            pl.BlockSpec((tile_n, d), lambda i, j: (i, 0)),   # activation rows
            w_spec,
            b_spec,
        ],
        out_specs=pl.BlockSpec((tile_n, d), lambda i, j: (i, 0)),
        scratch_shapes=scratch_shapes,
        compiler_params=pltpu.CompilerParams(
            dimension_semantics=("parallel", "arbitrary"),
            vmem_limit_bytes=vmem_limit_bytes,
        ),
        cost_estimate=cost,
    )(x, w, b)


def pad_highway_params(w, b):
    """Pad stacked params to lane-dense (L, Dp, 2Dp)/(L, 1, 2Dp), Dp = round_up(max(D,128),128).

    Each projection half is padded separately so the nonlinear|gate split still
    sits at column Dp inside the kernel.  Padded columns are all zero, so padded
    activations stay exactly zero through every layer.  Call once at parameter
    init/conversion time; highway_forward falls back to padding per call otherwise.
    """
    num_layers, d, two_d = w.shape
    assert two_d == 2 * d and b.shape == (num_layers, 1, 2 * d)
    dp = _round_up(max(d, _LANE), _LANE)
    if dp == d:
        return w, b
    w_h = _pad_to(w[:, :, :d], (num_layers, dp, dp))
    w_g = _pad_to(w[:, :, d:], (num_layers, dp, dp))
    b_h = _pad_to(b[:, :, :d], (num_layers, 1, dp))
    b_g = _pad_to(b[:, :, d:], (num_layers, 1, dp))
    return jnp.concatenate([w_h, w_g], axis=-1), jnp.concatenate([b_h, b_g], axis=-1)


@functools.partial(jax.jit, static_argnames=("tile_n", "resident_weights"))
def highway_forward(x, w, b, *, tile_n=1024, resident_weights=None):
    """Run the full highway stack.

    x: (N, D) activations (f32 or bf16).
    w: (L, D, 2D) stacked weights pre-transposed for x @ w (or pre-padded
       (L, Dp, 2Dp) from pad_highway_params); columns [0:D) nonlinear, [D:2D) gate.
    b: (L, 1, 2D) (or pre-padded (L, 1, 2Dp)) stacked biases, same column split.
    tile_n: rows per grid step (sweep parameter; biggest that fits VMEM wins).
    resident_weights: keep the full weight stack VMEM-resident (None = auto).
    """
    n, d = x.shape
    num_layers = w.shape[0]
    dp = _round_up(max(d, _LANE), _LANE)

    if w.shape[1:] != (dp, 2 * dp):
        # Slow path: pad per call.  Prefer pad_highway_params once at init.
        assert w.shape == (num_layers, d, 2 * d) and b.shape == (num_layers, 1, 2 * d)
        w, b = pad_highway_params(w, b)
    assert w.shape == (num_layers, dp, 2 * dp) and b.shape == (num_layers, 1, 2 * dp)

    # Row tiling: sublane multiple; keep >=2 row tiles when there is enough
    # work so the "parallel" axis can use both v7x TensorCores.
    n8 = _round_up(n, _SUBLANE)
    tn = min(_round_up(tile_n, _SUBLANE), n8)
    if tn >= n8 and n8 >= 2 * _MIN_SPLIT_ROWS:
        tn = _round_up((n8 + 1) // 2, _SUBLANE)
    n_pad = _round_up(n, tn)

    w_itemsize = jnp.dtype(w.dtype).itemsize
    x_itemsize = jnp.dtype(x.dtype).itemsize
    wb_bytes = num_layers * (dp * 2 * dp * w_itemsize
                             + _SUBLANE * 2 * dp * jnp.dtype(b.dtype).itemsize)
    if resident_weights is None:
        resident_weights = 2 * wb_bytes <= _RESIDENT_WEIGHT_BUDGET_BYTES

    # Scoped-VMEM budget: resident params (x2 buffers) + double-buffered x/out
    # tiles + f32 carry scratch (bf16 I/O only) + f32 epilogue temps; capped at
    # v7x's 64 MiB physical so one setting is safe on v5e/v6e/v7x.
    needed = (2 * wb_bytes
              + 4 * tn * dp * x_itemsize
              + (0 if x.dtype == jnp.float32 else tn * dp * 4)
              + 3 * tn * 2 * dp * 4
              + (2 << 20))
    vmem_limit_bytes = int(min(max(needed, 32 << 20), 64 << 20))

    cost = pl.CostEstimate(
        flops=2 * n_pad * dp * 2 * dp * num_layers,
        transcendentals=n_pad * dp * num_layers,
        bytes_accessed=(2 * n_pad * dp * x_itemsize
                        + num_layers * (dp * 2 * dp * w_itemsize + 2 * dp * 4)),
    )

    xp = _pad_to(x, (n_pad, dp))
    out = _highway_pallas(xp, w, b, tile_n=tn, resident_weights=resident_weights,
                          vmem_limit_bytes=vmem_limit_bytes, cost=cost)
    if n_pad == n and dp == d:
        return out
    return out[:n, :d]


def init_highway_params(key, input_dim, num_layers):
    """Synthetic params matching nn.Linear(D, 2D) per layer with gate bias = 1.

    Returns (w, b): w (L, D, 2D) = weight.T; b (L, 1, 2D) with b[:, :, D:] = 1.
    """
    ws, bs = [], []
    bound = 1.0 / float(input_dim) ** 0.5
    for _ in range(num_layers):
        key, k_w, k_b = jax.random.split(key, 3)
        weight = jax.random.uniform(
            k_w, (2 * input_dim, input_dim), jnp.float32, -bound, bound)
        bias = jax.random.uniform(
            k_b, (2 * input_dim,), jnp.float32, -bound, bound)
        bias = bias.at[input_dim:].set(1.0)            # gate bias init to 1
        ws.append(weight.T)                            # (D, 2D)
        bs.append(bias.reshape(1, 2 * input_dim))
    return jnp.stack(ws), jnp.stack(bs)


def _reference(x, w, b):
    d = x.shape[1]
    cur = x
    for i in range(w.shape[0]):
        proj = jnp.dot(cur, w[i], precision=jax.lax.Precision.HIGHEST) + b[i]
        nonlinear = jnp.maximum(proj[:, :d], 0.0)
        gate = jax.nn.sigmoid(proj[:, d:])
        cur = gate * cur + (1.0 - gate) * nonlinear
    return cur


if __name__ == "__main__":
    key = jax.random.PRNGKey(0)
    k_x, k_p, k_x2, k_p2 = jax.random.split(key, 4)

    # Case 1: lane-dense D, three fused layers, f32 params, resident weight stack.
    n, d, layers = 512, 128, 3
    x = jax.random.normal(k_x, (n, d), jnp.float32)
    w, b = init_highway_params(k_p, d, layers)
    ref = _reference(x, w, b)
    out = jax.block_until_ready(highway_forward(x, w, b))
    assert out.shape == (n, d)
    assert jnp.allclose(out, ref, atol=2e-4, rtol=2e-4)

    # Case 2: multi-row-tile grid + per-layer streamed (non-resident) weights.
    out_tiled = jax.block_until_ready(
        highway_forward(x, w, b, tile_n=128, resident_weights=False))
    assert jnp.allclose(out_tiled, ref, atol=2e-4, rtol=2e-4)

    # Case 3: bf16 weights (MXU-native operands), f32 carry / epilogue.
    w_bf16 = w.astype(jnp.bfloat16)
    out_bf16 = jax.block_until_ready(highway_forward(x, w_bf16, b))
    assert jnp.allclose(out_bf16, ref, atol=6e-2, rtol=6e-2)

    # Case 4: bf16 activations + bf16 weights (f32 scratch-carry path).
    out_all_bf16 = jax.block_until_ready(
        highway_forward(x.astype(jnp.bfloat16), w_bf16, b))
    assert jnp.allclose(out_all_bf16.astype(jnp.float32), ref, atol=8e-2, rtol=8e-2)

    # Case 5: small, module-faithful shapes (D=32, N=8) with params pre-padded
    # once at init time (lane-dense padding path).
    n2, d2, layers2 = 8, 32, 2
    x2 = jax.random.normal(k_x2, (n2, d2), jnp.float32)
    w2, b2 = init_highway_params(k_p2, d2, layers2)
    w2p, b2p = pad_highway_params(w2, b2)
    out2 = jax.block_until_ready(highway_forward(x2, w2p, b2p))
    ref2 = _reference(x2, w2, b2)
    assert out2.shape == (n2, d2)
    assert jnp.allclose(out2, ref2, atol=2e-4, rtol=2e-4)

    print("KERNEL_OK")
</pallas_src>

<mosaic_0001>
module attributes {stable_mosaic.version = 11 : i64} {
  func.func @_highway_fused_kernel(%arg0: i32, %arg1: i32, %arg2: memref<512x128xf32, #tpu.memory_space<vmem>>, %arg3: memref<3x128x256xf32, #tpu.memory_space<vmem>>, %arg4: memref<3x1x256xf32, #tpu.memory_space<vmem>>, %arg5: memref<512x128xf32, #tpu.memory_space<vmem>>) attributes {dimension_semantics = [#tpu.dimension_semantics<parallel>, #tpu.dimension_semantics<arbitrary>], iteration_bounds = array<i64: 1, 3>, scalar_prefetch = 0 : i64, scratch_operands = 0 : i64, tpu.core_type = #tpu.core_type<tc>, window_params = [{transform_indices = @transform_0, window_bounds = array<i64: 512, 128>}, {pipeline_mode = #tpu.pipeline_mode<synchronous>, transform_indices = @transform_1, window_bounds = array<i64: 3, 128, 256>}, {pipeline_mode = #tpu.pipeline_mode<synchronous>, transform_indices = @transform_2, window_bounds = array<i64: 3, 1, 256>}, {transform_indices = @transform_3, window_bounds = array<i64: 512, 128>}]} {
    %c0_i32 = arith.constant 0 : i32
    %0 = arith.cmpi eq, %arg1, %c0_i32 : i32
    %1 = arith.extui %0 : i1 to i32
    %c0_i32_0 = arith.constant 0 : i32
    %2 = arith.cmpi ne, %1, %c0_i32_0 : i32
    scf.if %2 {
      %c0_10 = arith.constant 0 : index
      %c0_11 = arith.constant 0 : index
      %26 = vector.load %arg2[%c0_10, %c0_11] : memref<512x128xf32, #tpu.memory_space<vmem>>, vector<512x128xf32>
      %c0_12 = arith.constant 0 : index
      %c0_13 = arith.constant 0 : index
      %27 = vector.load %arg5[%c0_12, %c0_13] : memref<512x128xf32, #tpu.memory_space<vmem>>, vector<512x128xf32>
      tpu.vector_store %arg5[%c0_12, %c0_13], %26 {strides = array<i32>} : memref<512x128xf32, #tpu.memory_space<vmem>>, vector<512x128xf32>,
    } else {
    }
    %c0 = arith.constant 0 : index
    %c0_1 = arith.constant 0 : index
    %3 = vector.load %arg5[%c0, %c0_1] : memref<512x128xf32, #tpu.memory_space<vmem>>, vector<512x128xf32>
    %4 = arith.index_cast %arg1 : i32 to index
    %c0_2 = arith.constant 0 : index
    %c0_3 = arith.constant 0 : index
    %5 = vector.load %arg3[%4, %c0_2, %c0_3] : memref<3x128x256xf32, #tpu.memory_space<vmem>>, vector<1x128x256xf32>
    %6 = vector.shape_cast %5 : vector<1x128x256xf32> to vector<128x256xf32>
    %7 = arith.index_cast %arg1 : i32 to index
    %c0_4 = arith.constant 0 : index
    %c0_5 = arith.constant 0 : index
    %8 = vector.load %arg4[%7, %c0_4, %c0_5] : memref<3x1x256xf32, #tpu.memory_space<vmem>>, vector<1x1x256xf32>
    %9 = vector.shape_cast %8 : vector<1x1x256xf32> to vector<1x256xf32>
    %cst = arith.constant dense<0.000000e+00> : vector<512x256xf32>
    %10 = tpu.matmul %3, %6, %cst {dimension_numbers = #tpu.dot_dimension_numbers<[1], [0], [0], [1], [0, 0, 1, 1], [], []>} : vector<512x128xf32>, vector<128x256xf32>, vector<512x256xf32> -> vector<512x256xf32>
    %11 = vector.broadcast %9 : vector<1x256xf32> to vector<512x256xf32>
    %12 = arith.addf %10, %11 : vector<512x256xf32>
    %13 = vector.extract_strided_slice %12 {offsets = [0, 0], sizes = [512, 128], strides = [1, 1]} : vector<512x256xf32> to vector<512x128xf32>
    %cst_6 = arith.constant 0.000000e+00 : f32
    %14 = vector.broadcast %cst_6 : f32 to vector<512x128xf32>
    %15 = arith.maximumf %13, %14 : vector<512x128xf32>
    %16 = vector.extract_strided_slice %12 {offsets = [0, 128], sizes = [512, 128], strides = [1, 1]} : vector<512x256xf32> to vector<512x128xf32>
    %17 = arith.negf %16 : vector<512x128xf32>
    %18 = math.exp %17 : vector<512x128xf32>
    %cst_7 = arith.constant 1.000000e+00 : f32
    %19 = vector.broadcast %cst_7 : f32 to vector<512x128xf32>
    %20 = arith.addf %19, %18 : vector<512x128xf32>
    %21 = arith.divf %19, %20 : vector<512x128xf32>
    %22 = arith.subf %3, %15 : vector<512x128xf32>
    %23 = arith.mulf %21, %22 : vector<512x128xf32>
    %24 = arith.addf %15, %23 : vector<512x128xf32>
    %c0_8 = arith.constant 0 : index
    %c0_9 = arith.constant 0 : index
    %25 = vector.load %arg5[%c0_8, %c0_9] : memref<512x128xf32, #tpu.memory_space<vmem>>, vector<512x128xf32>
    tpu.vector_store %arg5[%c0_8, %c0_9], %24 {strides = array<i32>} : memref<512x128xf32, #tpu.memory_space<vmem>>, vector<512x128xf32>,
    return
  }
  func.func @transform_0(%arg0: i32, %arg1: i32) -> (i32, i32) {
    %c0_i32 = arith.constant 0 : i32
    %c0_i32_0 = arith.constant 0 : i32
    return %arg0, %c0_i32 : i32, i32
  }
  func.func @transform_1(%arg0: i32, %arg1: i32) -> (i32, i32, i32) {
    %c0_i32 = arith.constant 0 : i32
    %c0_i32_0 = arith.constant 0 : i32
    %c0_i32_1 = arith.constant 0 : i32
    %c0_i32_2 = arith.constant 0 : i32
    return %c0_i32, %c0_i32_0, %c0_i32_1 : i32, i32, i32
  }
  func.func @transform_2(%arg0: i32, %arg1: i32) -> (i32, i32, i32) {
    %c0_i32 = arith.constant 0 : i32
    %c0_i32_0 = arith.constant 0 : i32
    %c0_i32_1 = arith.constant 0 : i32
    %c0_i32_2 = arith.constant 0 : i32
    return %c0_i32, %c0_i32_0, %c0_i32_1 : i32, i32, i32
  }
  func.func @transform_3(%arg0: i32, %arg1: i32) -> (i32, i32) {
    %c0_i32 = arith.constant 0 : i32
    %c0_i32_0 = arith.constant 0 : i32
    return %arg0, %c0_i32 : i32, i32
  }
}

</mosaic_0001>

<bundles_post_ra>
// kernel: highway_forward.1
= control target key start
LH: loop header
LB: loop body
LE: loop exit
PB: predicated region body
PF: predicated region fallthrough
CT: control target
= control target key end

     0   :  { %8 = vsyncpa [#allocation3], 0  ;;  %s3312_s0 = inlined_call_operand.hbm [shape: f32[512,128], index: 0, kind: input, shape index: {}]   ;;  %s3313_s1 = inlined_call_operand.hbm [shape: f32[3,128,256], index: 1, kind: input, shape index: {}]   ;;  %s3314_s2 = inlined_call_operand.vmem [shape: f32[3,1,256], index: 2, kind: input, shape index: {}]   ;;  %s3315_s3 = inlined_call_operand.hbm [shape: f32[512,128], index: 3, kind: output, shape index: {}]  }
   0x1   :  { %9 = vsyncpa [#allocation6], 0 }
   0x2   :  { %10 = vsyncpa [#allocation4], 0  ;;  %s2305_s12 = smov 0   ;;  %s2307_s13 = smov 0  }
   0x3   :  { %s2309_s14 = smov 0  }
   0x4 LB: > { %s1670_s15 = sadd.s32 4294967295, %s2273_s14   ;;  %s25_s16 = sadd.s32 1, %s2269_s13  ;;  %s2273_s14 = sphi %s2309_s14, %s16_s14   ;;  %s2269_s13 = sphi %s2307_s13, %s3326_s13   ;;  %s2265_s12 = sphi %s2305_s12, %s3325_s12  }
   0x5   : > { %p26_p0 = scmp.ge.s32.totalorder %s25_s16, 3  ;;  %p1671_p1 = scmp.ge.s32.totalorder %s2273_s14, 1 }
   0x6   : > { %p127_p2 = scmp.lt.s32.totalorder %s2273_s14, 4  ;;  %p2332_p4 = scmp.eq.s32.totalorder %s1670_s15, 0 }
   0x7   : > { %s3328_s16 = smov (%p26_p0, %s25_s16), 0  ;;  %s2275_s19 = smov [#allocation2]  }
   0x8   : > { %p2326_p3 = pnand %p1671_p1, %p127_p2  ;;  %s142_s20 = sshll.u32 %s2275_s19, 4  ;;  %s143_s20 = int_to_ptr.vmem [resolvable:$true] %s142_s20 }
   0x9   : > { %s3320_s18 = scalar_select %p2332_p4, 1, 0 }
   0xa   : > { %s3319_s17 = scalar_select %p2326_p3, 1, 0 }
   0xb   : > { %p1810_p5 = pneg %p2326_p3  ;;  %s2276_s22 = smov [#allocation5]  }
   0xc   : > { %s155_s23 = sshll.u32 %s2276_s22, 4  ;;  %s2157_s26 = scalar_lea.hbm %s3312_s0, 8192  ;;  %s2344_s23 = int_to_ptr.vmem [resolvable:$true] %s155_s23 }
   0xd   : > { %p2340_p6 = pnand %p2332_p4, %p1810_p5  ;;  %p2158_p7 = scmp.ne.s32.totalorder %s3312_s0, %s2157_s26 }
   0xe   : > { %p2164_p11 = scmp.lt.u32.totalorder %s2157_s26, %s3312_s0 }
   0xf   : > { %p2159_p8 = pneg %p2340_p6 }
  0x11   : > { %p2160_p9 = pnand %p2159_p8, %p2158_p7 }
  0x13   : > { %p2161_p10 = pneg %p2160_p9 }
  0x15   : > { %p2166_p12 = pnand %p2164_p11, %p2161_p10 }
  0x17   : > { %2169 = shalt.err (!%p2166_p12)
}
  0x18   : > { %s2170_s4 = scalar_lea.vmem %s143_s20, 8192  ;;  %p2178_p2 = scmp.lt.s32.totalorder %s143_s20, %s143_s20 }
  0x19   : > { %p2171_p13 = scmp.ne.s32.totalorder %s143_s20, %s2170_s4  ;;  %p2179_p5 = scmp.lt.s32.totalorder %s2170_s4, %s2170_s4 }
  0x1b   : > { %p2173_p0 = pnand %p2171_p13, %p2159_p8  ;;  %p2180_p4 = por %p2179_p5, %p2178_p2 }
  0x1d   : > { %p2174_p1 = pneg %p2173_p0 }
  0x1f   : > { %p2181_p3 = pnand %p2180_p4, %p2174_p1 }
  0x21   : > { %2184 = shalt.err (!%p2181_p3)
}
  0x22   : > { %s2277_s5 = smov 128   ;;  %s2278_s6 = smov 8  }
  0x23   : > { %1813 = dma.hbm_to_vmem [thread:$0]  (!%p2340_p6), %s3312_s0, 8192, %s143_s20, [#allocation3], %s2277_s5, %s2277_s5, %s2278_s6  }
  0x24   : > { %s2185_s11 = scalar_lea.hbm %s3313_s1, 12288 }
  0x25   : > { %p2186_p7 = scmp.ne.s32.totalorder %s3313_s1, %s2185_s11  ;;  %p2192_p9 = scmp.lt.u32.totalorder %s2185_s11, %s3313_s1 }
  0x27   : > { %p2188_p3 = pnand %p2186_p7, %p2159_p8 }
  0x29   : > { %p2189_p4 = pneg %p2188_p3 }
  0x2b   : > { %p2194_p10 = pnand %p2192_p9, %p2189_p4 }
  0x2d   : > { %2197 = shalt.err (!%p2194_p10)
}
  0x2e   : > { %s2198_s20 = scalar_lea.vmem %s2344_s23, 12288  ;;  %p2206_p0 = scmp.lt.s32.totalorder %s2344_s23, %s2344_s23 }
  0x2f   : > { %p2199_p11 = scmp.ne.s32.totalorder %s2344_s23, %s2198_s20  ;;  %p2207_p1 = scmp.lt.s32.totalorder %s2198_s20, %s2198_s20 }
  0x31   : > { %p2201_p12 = pnand %p2199_p11, %p2159_p8  ;;  %p2208_p2 = por %p2207_p1, %p2206_p0 }
  0x33   : > { %p2202_p13 = pneg %p2201_p12 }
  0x35   : > { %p2209_p5 = pnand %p2208_p2, %p2202_p13 }
  0x37   : > { %2212 = shalt.err (!%p2209_p5)
}
  0x38   : > { %s2279_s26 = smov 256   ;;  %s2280_s27 = smov 16  }
  0x39   : > { %1816 = dma.hbm_to_vmem [thread:$0]  (!%p2340_p6), %s3313_s1, 12288, %s2344_s23, [#allocation6], %s2279_s26, %s2279_s26, %s2280_s27  }
  0x3a   : > { %p3322_p7 = scmp.ne.s32.totalorder %s3319_s17, 0 }
  0x3b   : > { %p3323_p8 = scmp.ne.s32.totalorder (!%p3322_p7), %s3320_s18, 0 }
  0x3c   : > { %174 = sbr.rel (%p3322_p7) target bundleno = 556 (0x22c), region = 32 }
  0x43   : > { %2252 = dma.done.wait (%p3323_p8), [#allocation3], 8192  }
  0x44   : > { %2254 = vsyncadd (%p3323_p8), [#allocation3], 4294959104 }
  0x45   : > { %2256 = dma.done.wait (%p3323_p8), [#allocation6], 12288  }
  0x46   : > { %2258 = vsyncadd (%p3323_p8), [#allocation6], 4294955008  ;;  %p1677_p3 = scmp.ne.s32.totalorder %s2265_s12, 0 }
  0x47   : > { %v198_v0 = vld [vmem:[#allocation2] sm:$0xff] (!%p1677_p3)  ;;  %v199_v1 = vld [vmem:[#allocation2 + $0x8] sm:$0xff] (!%p1677_p3)  ;;  %v200_v2 = vld [vmem:[#allocation2 + $0x10] sm:$0xff] (!%p1677_p3) }
  0x48   : > { %197 = sbr.rel (%p1677_p3) target bundleno = 104 (0x68), region = 44  ;;  %262 = vst [vmem:[#allocation7] sm:$0xff] (!%p1677_p3), %v198_v0  ;;  %263 = vst [vmem:[#allocation7 + $0x8] sm:$0xff] (!%p1677_p3), %v199_v1  ;;  %v201_v3 = vld [vmem:[#allocation2 + $0x18] sm:$0xff] (!%p1677_p3)  ;;  %v202_v4 = vld [vmem:[#allocation2 + $0x20] sm:$0xff] (!%p1677_p3) }
  0x49   : > { %264 = vst [vmem:[#allocation7 + $0x10] sm:$0xff] (!%p1677_p3), %v200_v2  ;;  %v203_v5 = vld [vmem:[#allocation2 + $0x28] sm:$0xff] (!%p1677_p3)  ;;  %265 = vst [vmem:[#allocation7 + $0x18] sm:$0xff] (!%p1677_p3), %v201_v3  ;;  %v204_v6 = vld [vmem:[#allocation2 + $0x30] sm:$0xff] (!%p1677_p3) }
  0x4a   : > { %266 = vst [vmem:[#allocation7 + $0x20] sm:$0xff] (!%p1677_p3), %v202_v4  ;;  %267 = vst [vmem:[#allocation7 + $0x28] sm:$0xff] (!%p1677_p3), %v203_v5  ;;  %v205_v7 = vld [vmem:[#allocation2 + $0x38] sm:$0xff] (!%p1677_p3)  ;;  %v206_v8 = vld [vmem:[#allocation2 + $0x40] sm:$0xff] (!%p1677_p3) }
  0x4b   : > { %268 = vst [vmem:[#allocation7 + $0x30] sm:$0xff] (!%p1677_p3), %v204_v6  ;;  %269 = vst [vmem:[#allocation7 + $0x38] sm:$0xff] (!%p1677_p3), %v205_v7  ;;  %v207_v9 = vld [vmem:[#allocation2 + $0x48] sm:$0xff] (!%p1677_p3)  ;;  %v208_v10 = vld [vmem:[#allocation2 + $0x50] sm:$0xff] (!%p1677_p3) }
  0x4c   : > { %270 = vst [vmem:[#allocation7 + $0x40] sm:$0xff] (!%p1677_p3), %v206_v8  ;;  %v209_v11 = vld [vmem:[#allocation2 + $0x58] sm:$0xff] (!%p1677_p3)  ;;  %271 = vst [vmem:[#allocation7 + $0x48] sm:$0xff] (!%p1677_p3), %v207_v9  ;;  %v210_v12 = vld [vmem:[#allocation2 + $0x60] sm:$0xff] (!%p1677_p3) }
  0x4d   : > { %272 = vst [vmem:[#allocation7 + $0x50] sm:$0xff] (!%p1677_p3), %v208_v10  ;;  %273 = vst [vmem:[#allocation7 + $0x58] sm:$0xff] (!%p1677_p3), %v209_v11  ;;  %v211_v13 = vld [vmem:[#allocation2 + $0x68] sm:$0xff] (!%p1677_p3)  ;;  %v212_v14 = vld [vmem:[#allocation2 + $0x70] sm:$0xff] (!%p1677_p3) }
  0x4e   : > { %274 = vst [vmem:[#allocation7 + $0x60] sm:$0xff] (!%p1677_p3), %v210_v12  ;;  %275 = vst [vmem:[#allocation7 + $0x68] sm:$0xff] (!%p1677_p3), %v211_v13  ;;  %v213_v15 = vld [vmem:[#allocation2 + $0x78] sm:$0xff] (!%p1677_p3)  ;;  %v214_v16 = vld [vmem:[#allocation2 + $0x80] sm:$0xff] (!%p1677_p3) }
  0x4f   : > { %276 = vst [vmem:[#allocation7 + $0x70] sm:$0xff] %v212_v14  ;;  %v215_v17 = vld [vmem:[#allocation2 + $0x88] sm:$0xff]  ;;  %277 = vst [vmem:[#allocation7 + $0x78] sm:$0xff] %v213_v15  ;;  %v216_v18 = vld [vmem:[#allocation2 + $0x90] sm:$0xff] }
  0x50   : > { %278 = vst [vmem:[#allocation7 + $0x80] sm:$0xff] %v214_v16  ;;  %279 = vst [vmem:[#allocation7 + $0x88] sm:$0xff] %v215_v17  ;;  %v217_v19 = vld [vmem:[#allocation2 + $0x98] sm:$0xff]  ;;  %v218_v20 = vld [vmem:[#allocation2 + $0xa0] sm:$0xff] }
  0x51   : > { %280 = vst [vmem:[#allocation7 + $0x90] sm:$0xff] %v216_v18  ;;  %281 = vst [vmem:[#allocation7 + $0x98] sm:$0xff] %v217_v19  ;;  %v219_v21 = vld [vmem:[#allocation2 + $0xa8] sm:$0xff]  ;;  %v220_v22 = vld [vmem:[#allocation2 + $0xb0] sm:$0xff] }
  0x52   : > { %282 = vst [vmem:[#allocation7 + $0xa0] sm:$0xff] %v218_v20  ;;  %v221_v23 = vld [vmem:[#allocation2 + $0xb8] sm:$0xff]  ;;  %283 = vst [vmem:[#allocation7 + $0xa8] sm:$0xff] %v219_v21  ;;  %v222_v24 = vld [vmem:[#allocation2 + $0xc0] sm:$0xff] }
  0x53   : > { %284 = vst [vmem:[#allocation7 + $0xb0] sm:$0xff] %v220_v22  ;;  %285 = vst [vmem:[#allocation7 + $0xb8] sm:$0xff] %v221_v23  ;;  %v223_v25 = vld [vmem:[#allocation2 + $0xc8] sm:$0xff]  ;;  %v224_v26 = vld [vmem:[#allocation2 + $0xd0] sm:$0xff] }
  0x54   : > { %286 = vst [vmem:[#allocation7 + $0xc0] sm:$0xff] %v222_v24  ;;  %287 = vst [vmem:[#allocation7 + $0xc8] sm:$0xff] %v223_v25  ;;  %v225_v27 = vld [vmem:[#allocation2 + $0xd8] sm:$0xff]  ;;  %v226_v28 = vld [vmem:[#allocation2 + $0xe0] sm:$0xff] }
  0x55   : > { %288 = vst [vmem:[#allocation7 + $0xd0] sm:$0xff] %v224_v26  ;;  %v227_v29 = vld [vmem:[#allocation2 + $0xe8] sm:$0xff]  ;;  %289 = vst [vmem:[#allocation7 + $0xd8] sm:$0xff] %v225_v27  ;;  %v228_v30 = vld [vmem:[#allocation2 + $0xf0] sm:$0xff] }
  0x56   : > { %290 = vst [vmem:[#allocation7 + $0xe0] sm:$0xff] %v226_v28  ;;  %291 = vst [vmem:[#allocation7 + $0xe8] sm:$0xff] %v227_v29  ;;  %v229_v31 = vld [vmem:[#allocation2 + $0xf8] sm:$0xff]  ;;  %v230_v32 = vld [vmem:[#allocation2 + $0x100] sm:$0xff] }
  0x57   : > { %292 = vst [vmem:[#allocation7 + $0xf0] sm:$0xff] %v228_v30  ;;  %293 = vst [vmem:[#allocation7 + $0xf8] sm:$0xff] %v229_v31  ;;  %v231_v33 = vld [vmem:[#allocation2 + $0x108] sm:$0xff]  ;;  %v232_v34 = vld [vmem:[#allocation2 + $0x110] sm:$0xff] }
  0x58   : > { %294 = vst [vmem:[#allocation7 + $0x100] sm:$0xff] %v230_v32  ;;  %v233_v35 = vld [vmem:[#allocation2 + $0x118] sm:$0xff]  ;;  %295 = vst [vmem:[#allocation7 + $0x108] sm:$0xff] %v231_v33  ;;  %v234_v36 = vld [vmem:[#allocation2 + $0x120] sm:$0xff] }
  0x59   : > { %296 = vst [vmem:[#allocation7 + $0x110] sm:$0xff] %v232_v34  ;;  %297 = vst [vmem:[#allocation7 + $0x118] sm:$0xff] %v233_v35  ;;  %v235_v37 = vld [vmem:[#allocation2 + $0x128] sm:$0xff]  ;;  %v236_v38 = vld [vmem:[#allocation2 + $0x130] sm:$0xff] }
  0x5a   : > { %298 = vst [vmem:[#allocation7 + $0x120] sm:$0xff] %v234_v36  ;;  %299 = vst [vmem:[#allocation7 + $0x128] sm:$0xff] %v235_v37  ;;  %v237_v39 = vld [vmem:[#allocation2 + $0x138] sm:$0xff]  ;;  %v238_v40 = vld [vmem:[#allocation2 + $0x140] sm:$0xff] }
  0x5b   : > { %300 = vst [vmem:[#allocation7 + $0x130] sm:$0xff] %v236_v38  ;;  %v239_v41 = vld [vmem:[#allocation2 + $0x148] sm:$0xff]  ;;  %301 = vst [vmem:[#allocation7 + $0x138] sm:$0xff] %v237_v39  ;;  %v240_v42 = vld [vmem:[#allocation2 + $0x150] sm:$0xff] }
  0x5c   : > { %302 = vst [vmem:[#allocation7 + $0x140] sm:$0xff] %v238_v40  ;;  %303 = vst [vmem:[#allocation7 + $0x148] sm:$0xff] %v239_v41  ;;  %v241_v43 = vld [vmem:[#allocation2 + $0x158] sm:$0xff]  ;;  %v242_v44 = vld [vmem:[#allocation2 + $0x160] sm:$0xff] }
  0x5d   : > { %304 = vst [vmem:[#allocation7 + $0x150] sm:$0xff] %v240_v42  ;;  %305 = vst [vmem:[#allocation7 + $0x158] sm:$0xff] %v241_v43  ;;  %v243_v45 = vld [vmem:[#allocation2 + $0x168] sm:$0xff]  ;;  %v244_v46 = vld [vmem:[#allocation2 + $0x170] sm:$0xff] }
  0x5e   : > { %306 = vst [vmem:[#allocation7 + $0x160] sm:$0xff] %v242_v44  ;;  %v245_v47 = vld [vmem:[#allocation2 + $0x178] sm:$0xff]  ;;  %307 = vst [vmem:[#allocation7 + $0x168] sm:$0xff] %v243_v45  ;;  %v246_v48 = vld [vmem:[#allocation2 + $0x180] sm:$0xff] }
  0x5f   : > { %308 = vst [vmem:[#allocation7 + $0x170] sm:$0xff] %v244_v46  ;;  %309 = vst [vmem:[#allocation7 + $0x178] sm:$0xff] %v245_v47  ;;  %v247_v49 = vld [vmem:[#allocation2 + $0x188] sm:$0xff]  ;;  %v248_v50 = vld [vmem:[#allocation2 + $0x190] sm:$0xff] }
  0x60   : > { %310 = vst [vmem:[#allocation7 + $0x180] sm:$0xff] %v246_v48  ;;  %311 = vst [vmem:[#allocation7 + $0x188] sm:$0xff] %v247_v49  ;;  %v249_v51 = vld [vmem:[#allocation2 + $0x198] sm:$0xff]  ;;  %v250_v52 = vld [vmem:[#allocation2 + $0x1a0] sm:$0xff] }
  0x61   : > { %312 = vst [vmem:[#allocation7 + $0x190] sm:$0xff] %v248_v50  ;;  %v251_v53 = vld [vmem:[#allocation2 + $0x1a8] sm:$0xff]  ;;  %313 = vst [vmem:[#allocation7 + $0x198] sm:$0xff] %v249_v51  ;;  %v252_v54 = vld [vmem:[#allocation2 + $0x1b0] sm:$0xff] }
  0x62   : > { %314 = vst [vmem:[#allocation7 + $0x1a0] sm:$0xff] %v250_v52  ;;  %315 = vst [vmem:[#allocation7 + $0x1a8] sm:$0xff] %v251_v53  ;;  %v253_v55 = vld [vmem:[#allocation2 + $0x1b8] sm:$0xff]  ;;  %v254_v56 = vld [vmem:[#allocation2 + $0x1c0] sm:$0xff] }
  0x63   : > { %316 = vst [vmem:[#allocation7 + $0x1b0] sm:$0xff] %v252_v54  ;;  %317 = vst [vmem:[#allocation7 + $0x1b8] sm:$0xff] %v253_v55  ;;  %v255_v57 = vld [vmem:[#allocation2 + $0x1c8] sm:$0xff]  ;;  %v256_v58 = vld [vmem:[#allocation2 + $0x1d0] sm:$0xff] }
  0x64   : > { %318 = vst [vmem:[#allocation7 + $0x1c0] sm:$0xff] %v254_v56  ;;  %v257_v59 = vld [vmem:[#allocation2 + $0x1d8] sm:$0xff]  ;;  %319 = vst [vmem:[#allocation7 + $0x1c8] sm:$0xff] %v255_v57  ;;  %v258_v60 = vld [vmem:[#allocation2 + $0x1e0] sm:$0xff] }
  0x65   : > { %320 = vst [vmem:[#allocation7 + $0x1d0] sm:$0xff] %v256_v58  ;;  %321 = vst [vmem:[#allocation7 + $0x1d8] sm:$0xff] %v257_v59  ;;  %v259_v61 = vld [vmem:[#allocation2 + $0x1e8] sm:$0xff]  ;;  %v260_v62 = vld [vmem:[#allocation2 + $0x1f0] sm:$0xff] }
  0x66   : > { %322 = vst [vmem:[#allocation7 + $0x1e0] sm:$0xff] %v258_v60  ;;  %323 = vst [vmem:[#allocation7 + $0x1e8] sm:$0xff] %v259_v61  ;;  %v261_v63 = vld [vmem:[#allocation2 + $0x1f8] sm:$0xff] }
  0x67   : > { %324 = vst [vmem:[#allocation7 + $0x1f0] sm:$0xff] %v260_v62  ;;  %325 = vst [vmem:[#allocation7 + $0x1f8] sm:$0xff] %v261_v63 }
  0x68 PF: > { %s1749_s17 = sshll.u32 %s2265_s12, 8  ;;  %v2281_v0 = vmov 0.0   ;;  %v2441_v49 = vld [vmem:[#allocation7] sm:$0xff]  ;;  %v2449_v51 = vld [vmem:[#allocation7 + $0x8] sm:$0xff]  ;;  %v2459_v54 = vld [vmem:[#allocation7 + $0x110] sm:$0xff]  ;;  %s1680_s21 = sshll.u32 %s2265_s12, 1 }
  0x69   : > { %503 = vmatprep.mubr.f32.mxu0 %v2281_v0  ;;  %695 = vmatprep.mubr.f32.mxu1 %v2281_v0  ;;  %s2407_s18 = scalar_lea.vmem [#allocation5], %s1749_s17  ;;  %v2443_v50 = vld [vmem:[#allocation7 + $0x100] sm:$0xff]  ;;  %v2451_v52 = vld [vmem:[#allocation7 + $0x108] sm:$0xff]  ;;  %v2457_v53 = vld [vmem:[#allocation7 + $0x10] sm:$0xff]  ;;  %s426_s4 = scalar_lea.vmem %s3314_s2, %s1680_s21 }
  0x6a   : > { %v394_v1 = vld [vmem:[%s2407_s18 + $0x8] sm:$0xff]  ;;  %v396_v2 = vld [vmem:[%s2407_s18 + $0x18] sm:$0xff]  ;;  %v393_v3 = vld [vmem:[%s2407_s18] sm:$0xff]  ;;  %s2282_s12 = smov [#allocation7]   ;;  %p3277_p6 = scmp.eq.s32.totalorder %s1670_s15, 2 }
  0x6b   : > { %v1750_v4 = vpack.c.bf16 %v396_v2, %v394_v1  ;;  %v395_v5 = vld [vmem:[%s2407_s18 + $0x10] sm:$0xff]  ;;  %v398_v6 = vld [vmem:[%s2407_s18 + $0x28] sm:$0xff]  ;;  %v400_v7 = vld [vmem:[%s2407_s18 + $0x38] sm:$0xff]  ;;  %s1601_s5 = sshll.u32 %s2282_s12, 4  ;;  %s1602_s5 = int_to_ptr.vmem [resolvable:$true] %s1601_s5 }
  0x6c   : > { %v1752_v8 = vpack.c.bf16 %v395_v5, %v393_v3  ;;  %v1754_v9 = vpack.c.bf16 %v400_v7, %v398_v6  ;;  %v397_v10 = vld [vmem:[%s2407_s18 + $0x20] sm:$0xff]  ;;  %v399_v11 = vld [vmem:[%s2407_s18 + $0x30] sm:$0xff]  ;;  %v402_v12 = vld [vmem:[%s2407_s18 + $0x48] sm:$0xff]  ;;  %s2213_s7 = scalar_lea.vmem %s1602_s5, 8192  ;;  %p2220_p11 = scmp.lt.s32.totalorder %s1602_s5, %s1602_s5 }
  0x6d   : > { %1751 = vmatprep.subr.bf16.mxu0 %v1750_v4  ;;  %1782 = vmatprep.subr.bf16.mxu1 %v1750_v4  ;;  %v404_v13 = vld [vmem:[%s2407_s18 + $0x58] sm:$0xff]  ;;  %v1756_v14 = vpack.c.bf16 %v399_v11, %v397_v10  ;;  %v401_v16 = vld [vmem:[%s2407_s18 + $0x40] sm:$0xff]  ;;  %v403_v17 = vld [vmem:[%s2407_s18 + $0x50] sm:$0xff]  ;;  %p2214_p4 = scmp.ne.s32.totalorder %s1602_s5, %s2213_s7  ;;  %p2221_p12 = scmp.lt.s32.totalorder %s2213_s7, %s2213_s7 }
  0x6e   : > { %1753 = vmatpush1.bf16.msra.mxu0 %v1752_v8  ;;  %1790 = vmatpush1.bf16.msra.mxu1 %v1752_v8  ;;  %v1758_v15 = vpack.c.bf16 %v404_v13, %v402_v12  ;;  %v406_v18 = vld [vmem:[%s2407_s18 + $0x68] sm:$0xff]  ;;  %v408_v19 = vld [vmem:[%s2407_s18 + $0x78] sm:$0xff]  ;;  %v1760_v20 = vpack.c.bf16 %v403_v17, %v401_v16  ;;  %v405_v22 = vld [vmem:[%s2407_s18 + $0x60] sm:$0xff] }
  0x6f   : > { %1755 = vmatprep.subr.bf16.mxu0 %v1754_v9  ;;  %1783 = vmatprep.subr.bf16.mxu1 %v1754_v9  ;;  %v1762_v21 = vpack.c.bf16 %v408_v19, %v406_v18  ;;  %v407_v23 = vld [vmem:[%s2407_s18 + $0x70] sm:$0xff]  ;;  %v410_v24 = vld [vmem:[%s2407_s18 + $0x88] sm:$0xff]  ;;  %v412_v25 = vld [vmem:[%s2407_s18 + $0x98] sm:$0xff]  ;;  %p2215_p9 = pnand %p2214_p4, %p3277_p6  ;;  %p2222_p13 = por %p2221_p12, %p2220_p11 }
  0x70   : > { %v1764_v26 = vpack.c.bf16 %v407_v23, %v405_v22  ;;  %v1766_v27 = vpack.c.bf16 %v412_v25, %v410_v24  ;;  %v409_v28 = vld [vmem:[%s2407_s18 + $0x80] sm:$0xff]  ;;  %v411_v29 = vld [vmem:[%s2407_s18 + $0x90] sm:$0xff]  ;;  %v414_v30 = vld [vmem:[%s2407_s18 + $0xa8] sm:$0xff] }
  0x71   : > { %v416_v31 = vld [vmem:[%s2407_s18 + $0xb8] sm:$0xff]  ;;  %v1768_v32 = vpack.c.bf16 %v411_v29, %v409_v28  ;;  %v413_v34 = vld [vmem:[%s2407_s18 + $0xa0] sm:$0xff]  ;;  %v415_v35 = vld [vmem:[%s2407_s18 + $0xb0] sm:$0xff]  ;;  %p2216_p10 = pneg %p2215_p9 }
  0x72   : > { %1757 = vmatpush1.bf16.msra.mxu0 %v1756_v14  ;;  %1791 = vmatpush1.bf16.msra.mxu1 %v1756_v14  ;;  %v1770_v33 = vpack.c.bf16 %v416_v31, %v414_v30  ;;  %v418_v36 = vld [vmem:[%s2407_s18 + $0xc8] sm:$0xff]  ;;  %v420_v37 = vld [vmem:[%s2407_s18 + $0xd8] sm:$0xff]  ;;  %v1772_v38 = vpack.c.bf16 %v415_v35, %v413_v34  ;;  %v417_v40 = vld [vmem:[%s2407_s18 + $0xc0] sm:$0xff] }
  0x73   : > { %1759 = vmatprep.subr.bf16.mxu0 %v1758_v15  ;;  %1784 = vmatprep.subr.bf16.mxu1 %v1758_v15  ;;  %v1774_v39 = vpack.c.bf16 %v420_v37, %v418_v36  ;;  %v419_v41 = vld [vmem:[%s2407_s18 + $0xd0] sm:$0xff]  ;;  %v422_v42 = vld [vmem:[%s2407_s18 + $0xe8] sm:$0xff]  ;;  %v424_v43 = vld [vmem:[%s2407_s18 + $0xf8] sm:$0xff]  ;;  %p2223_p0 = pnand %p2222_p13, %p2216_p10 }
  0x74   : > { %v1776_v44 = vpack.c.bf16 %v419_v41, %v417_v40  ;;  %v1778_v45 = vpack.c.bf16 %v424_v43, %v422_v42  ;;  %v421_v46 = vld [vmem:[%s2407_s18 + $0xe0] sm:$0xff]  ;;  %v423_v47 = vld [vmem:[%s2407_s18 + $0xf0] sm:$0xff]  ;;  %v2465_v55 = vld [vmem:[#allocation7 + $0x18] sm:$0xff] }
  0x75   : > { %v1780_v48 = vpack.c.bf16 %v423_v47, %v421_v46  ;;  %v2467_v56 = vld [vmem:[#allocation7 + $0x118] sm:$0xff]  ;;  %v2473_v57 = vld [vmem:[#allocation7 + $0x20] sm:$0xff]  ;;  %v2481_v59 = vld [vmem:[#allocation7 + $0x28] sm:$0xff] }
  0x76   : > { %1761 = vmatpush1.bf16.msra.mxu0 %v1760_v20  ;;  %1792 = vmatpush1.bf16.msra.mxu1 %v1760_v20  ;;  %v2475_v58 = vld [vmem:[#allocation7 + $0x120] sm:$0xff]  ;;  %v2483_v60 = vld [vmem:[#allocation7 + $0x128] sm:$0xff]  ;;  %v2489_v61 = vld [vmem:[#allocation7 + $0x30] sm:$0xff] }
  0x77   : > { %1763 = vmatprep.subr.bf16.mxu0 %v1762_v21  ;;  %1785 = vmatprep.subr.bf16.mxu1 %v1762_v21  ;;  %v2491_v62 = vld [vmem:[#allocation7 + $0x130] sm:$0xff]  ;;  %v2497_v63 = vld [vmem:[#allocation7 + $0x38] sm:$0xff]  ;;  %v2505_v2 = vld [vmem:[#allocation7 + $0x40] sm:$0xff] }
  0x78   : > { %v2499_v1 = vld [vmem:[#allocation7 + $0x138] sm:$0xff]  ;;  %v2507_v3 = vld [vmem:[#allocation7 + $0x140] sm:$0xff]  ;;  %v2513_v4 = vld [vmem:[#allocation7 + $0x48] sm:$0xff] }
  0x79   : > { %v2515_v5 = vld [vmem:[#allocation7 + $0x148] sm:$0xff]  ;;  %v336_v6 = vld [vmem:[#allocation7 + $0x50] sm:$0xff]  ;;  %v337_v8 = vld [vmem:[#allocation7 + $0x58] sm:$0xff] }
  0x7a   : > { %1765 = vmatpush1.bf16.msra.mxu0 %v1764_v26  ;;  %1793 = vmatpush1.bf16.msra.mxu1 %v1764_v26  ;;  %v368_v7 = vld [vmem:[#allocation7 + $0x150] sm:$0xff]  ;;  %v369_v9 = vld [vmem:[#allocation7 + $0x158] sm:$0xff]  ;;  %v338_v10 = vld [vmem:[#allocation7 + $0x60] sm:$0xff] }
  0x7b   : > { %1767 = vmatprep.subr.bf16.mxu0 %v1766_v27  ;;  %1786 = vmatprep.subr.bf16.mxu1 %v1766_v27  ;;  %v370_v11 = vld [vmem:[#allocation7 + $0x160] sm:$0xff]  ;;  %v339_v12 = vld [vmem:[#allocation7 + $0x68] sm:$0xff]  ;;  %v340_v14 = vld [vmem:[#allocation7 + $0x70] sm:$0xff] }
  0x7c   : > { %v371_v13 = vld [vmem:[#allocation7 + $0x168] sm:$0xff]  ;;  %v372_v15 = vld [vmem:[#allocation7 + $0x170] sm:$0xff]  ;;  %v341_v16 = vld [vmem:[#allocation7 + $0x78] sm:$0xff] }
  0x7d   : > { %v373_v17 = vld [vmem:[#allocation7 + $0x178] sm:$0xff]  ;;  %v342_v18 = vld [vmem:[#allocation7 + $0x80] sm:$0xff]  ;;  %v343_v20 = vld [vmem:[#allocation7 + $0x88] sm:$0xff] }
  0x7e   : > { %1769 = vmatpush1.bf16.msra.mxu0 %v1768_v32  ;;  %1794 = vmatpush1.bf16.msra.mxu1 %v1768_v32  ;;  %v374_v19 = vld [vmem:[#allocation7 + $0x180] sm:$0xff]  ;;  %v375_v21 = vld [vmem:[#allocation7 + $0x188] sm:$0xff]  ;;  %v344_v22 = vld [vmem:[#allocation7 + $0x90] sm:$0xff] }
  0x7f   : > { %1771 = vmatprep.subr.bf16.mxu0 %v1770_v33  ;;  %1787 = vmatprep.subr.bf16.mxu1 %v1770_v33  ;;  %v376_v23 = vld [vmem:[#allocation7 + $0x190] sm:$0xff]  ;;  %v345_v24 = vld [vmem:[#allocation7 + $0x98] sm:$0xff]  ;;  %v346_v26 = vld [vmem:[#allocation7 + $0xa0] sm:$0xff] }
  0x80   : > { %v377_v25 = vld [vmem:[#allocation7 + $0x198] sm:$0xff]  ;;  %v378_v27 = vld [vmem:[#allocation7 + $0x1a0] sm:$0xff]  ;;  %v347_v28 = vld [vmem:[#allocation7 + $0xa8] sm:$0xff] }
  0x81   : > { %v379_v29 = vld [vmem:[#allocation7 + $0x1a8] sm:$0xff]  ;;  %v348_v30 = vld [vmem:[#allocation7 + $0xb0] sm:$0xff]  ;;  %v349_v32 = vld [vmem:[#allocation7 + $0xb8] sm:$0xff] }
  0x82   : > { %1773 = vmatpush1.bf16.msra.mxu0 %v1772_v38  ;;  %1795 = vmatpush1.bf16.msra.mxu1 %v1772_v38  ;;  %v380_v31 = vld [vmem:[#allocation7 + $0x1b0] sm:$0xff]  ;;  %v381_v33 = vld [vmem:[#allocation7 + $0x1b8] sm:$0xff]  ;;  %v350_v34 = vld [vmem:[#allocation7 + $0xc0] sm:$0xff] }
  0x83   : > { %1775 = vmatprep.subr.bf16.mxu0 %v1774_v39  ;;  %1788 = vmatprep.subr.bf16.mxu1 %v1774_v39  ;;  %v382_v35 = vld [vmem:[#allocation7 + $0x1c0] sm:$0xff]  ;;  %v351_v36 = vld [vmem:[#allocation7 + $0xc8] sm:$0xff]  ;;  %v352_v38 = vld [vmem:[#allocation7 + $0xd0] sm:$0xff] }
  0x84   : > { %v383_v37 = vld [vmem:[#allocation7 + $0x1c8] sm:$0xff]  ;;  %v384_v39 = vld [vmem:[#allocation7 + $0x1d0] sm:$0xff]  ;;  %v353_v40 = vld [vmem:[#allocation7 + $0xd8] sm:$0xff] }
  0x85   : > { %v385_v41 = vld [vmem:[#allocation7 + $0x1d8] sm:$0xff]  ;;  %v354_v42 = vld [vmem:[#allocation7 + $0xe0] sm:$0xff]  ;;  %v356_v46 = vld [vmem:[#allocation7 + $0xf0] sm:$0xff] }
  0x86   : > { %1777 = vmatpush1.bf16.msra.mxu0 %v1776_v44  ;;  %1796 = vmatpush1.bf16.msra.mxu1 %v1776_v44  ;;  %v386_v43 = vld [vmem:[#allocation7 + $0x1e0] sm:$0xff]  ;;  %v355_v44 = vld [vmem:[#allocation7 + $0xe8] sm:$0xff]  ;;  %v388_v47 = vld [vmem:[#allocation7 + $0x1f0] sm:$0xff] }
  0x87   : > { %1779 = vmatprep.subr.bf16.mxu0 %v1778_v45  ;;  %1789 = vmatprep.subr.bf16.mxu1 %v1778_v45  ;;  %v387_v45 = vld [vmem:[#allocation7 + $0x1e8] sm:$0xff] }
  0x8a   : > { %1781 = vmatpush1.bf16.msra.mxu0 %v1780_v48  ;;  %1797 = vmatpush1.bf16.msra.mxu1 %v1780_v48  ;;  %v357_v48 = vld [vmem:[#allocation7 + $0xf8] sm:$0xff] }
  0x8d   : > { %504 = vmatmul.mubr.f32.vlgmr.msra.gmra.mrb[0].mxu0 %v2441_v49  ;;  %696 = vmatmul.mubr.f32.vlgmr.msra.gmra.mrb[0].mxu1 %v2443_v50 }
  0x8e   : > { %509 = vmatprep.mubr.f32.mxu0 %v2281_v0  ;;  %701 = vmatprep.mubr.f32.mxu1 %v2281_v0 }
  0x91   : > { %510 = vmatmul.mubr.f32.gmra.mrb[2].mxu0 %v2449_v51  ;;  %702 = vmatmul.mubr.f32.gmra.mrb[2].mxu1 %v2451_v52 }
  0x92   : > { %515 = vmatprep.mubr.f32.mxu0 %v2281_v0  ;;  %707 = vmatprep.mubr.f32.mxu1 %v2281_v0 }
  0x95   : > { %516 = vmatmul.mubr.f32.gmra.mrb[4].mxu0 %v2457_v53  ;;  %708 = vmatmul.mubr.f32.gmra.mrb[4].mxu1 %v2459_v54 }
  0x96   : > { %521 = vmatprep.mubr.f32.mxu0 %v2281_v0  ;;  %713 = vmatprep.mubr.f32.mxu1 %v2281_v0 }
  0x99   : > { %522 = vmatmul.mubr.f32.gmra.mrb[6].mxu0 %v2465_v55  ;;  %714 = vmatmul.mubr.f32.gmra.mrb[6].mxu1 %v2467_v56 }
  0x9a   : > { %527 = vmatprep.mubr.f32.mxu0 %v2281_v0  ;;  %719 = vmatprep.mubr.f32.mxu1 %v2281_v0 }
  0x9d   : > { %528 = vmatmul.mubr.f32.gmra.mrb[8].mxu0 %v2473_v57  ;;  %720 = vmatmul.mubr.f32.gmra.mrb[8].mxu1 %v2475_v58 }
  0x9e   : > { %533 = vmatprep.mubr.f32.mxu0 %v2281_v0  ;;  %725 = vmatprep.mubr.f32.mxu1 %v2281_v0 }
  0xa1   : > { %534 = vmatmul.mubr.f32.gmra.mrb[10].mxu0 %v2481_v59  ;;  %726 = vmatmul.mubr.f32.gmra.mrb[10].mxu1 %v2483_v60 }
  0xa2   : > { %539 = vmatprep.mubr.f32.mxu0 %v2281_v0  ;;  %731 = vmatprep.mubr.f32.mxu1 %v2281_v0 }
  0xa5   : > { %540 = vmatmul.mubr.f32.gmra.mrb[12].mxu0 %v2489_v61  ;;  %732 = vmatmul.mubr.f32.gmra.mrb[12].mxu1 %v2491_v62 }
  0xa6   : > { %545 = vmatprep.mubr.f32.mxu0 %v2281_v0  ;;  %737 = vmatprep.mubr.f32.mxu1 %v2281_v0 }
  0xa9   : > { %546 = vmatmul.mubr.f32.gmra.mrb[14].mxu0 %v2497_v63  ;;  %738 = vmatmul.mubr.f32.gmra.mrb[14].mxu1 %v2499_v1 }
  0xaa   : > { %551 = vmatprep.mubr.f32.mxu0 %v2281_v0  ;;  %743 = vmatprep.mubr.f32.mxu1 %v2281_v0 }
  0xad   : > { %552 = vmatmul.mubr.f32.gmra.mrb[16].mxu0 %v2505_v2  ;;  %744 = vmatmul.mubr.f32.gmra.mrb[16].mxu1 %v2507_v3 }
  0xae   : > { %557 = vmatprep.mubr.f32.mxu0 %v2281_v0  ;;  %749 = vmatprep.mubr.f32.mxu1 %v2281_v0 }
  0xb1   : > { %558 = vmatmul.mubr.f32.gmra.mrb[18].mxu0 %v2513_v4  ;;  %750 = vmatmul.mubr.f32.gmra.mrb[18].mxu1 %v2515_v5 }
  0xb2   : > { %563 = vmatprep.mubr.f32.mxu0 %v2281_v0  ;;  %755 = vmatprep.mubr.f32.mxu1 %v2281_v0 }
  0xb5   : > { %564 = vmatmul.mubr.f32.gmra.mrb[20].mxu0 %v336_v6  ;;  %756 = vmatmul.mubr.f32.gmra.mrb[20].mxu1 %v368_v7  ;;  %v389_v6 = vld [vmem:[#allocation7 + $0x1f8] sm:$0xff]  ;;  %v429_v7 = vlaneseq }
  0xb6   : > { %569 = vmatprep.mubr.f32.mxu0 %v2281_v0  ;;  %761 = vmatprep.mubr.f32.mxu1 %v2281_v0 }
  0xb9   : > { %570 = vmatmul.mubr.f32.gmra.mrb[22].mxu0 %v337_v8  ;;  %762 = vmatmul.mubr.f32.gmra.mrb[22].mxu1 %v369_v9  ;;  %v430_v8 = vshrl.u32 %v429_v7, 7 }
  0xba   : > { %575 = vmatprep.mubr.f32.mxu0 %v2281_v0  ;;  %767 = vmatprep.mubr.f32.mxu1 %v2281_v0 }
  0xbb   : > { %v435_v9 = vsub.s32 1, %v430_v8 }
  0xbd   : > { %576 = vmatmul.mubr.f32.gmra.mrb[24].mxu0 %v338_v10  ;;  %768 = vmatmul.mubr.f32.gmra.mrb[24].mxu1 %v370_v11  ;;  %v427_v10 = vld [vmem:[%s426_s4] sm:$0x3] }
  0xbe   : > { %581 = vmatprep.mubr.f32.mxu0 %v2281_v0  ;;  %773 = vmatprep.mubr.f32.mxu1 %v2281_v0  ;;  %v2567_v11 = vrot.slane %v427_v10, %v435_v9 }
  0xc1   : > { %582 = vmatmul.mubr.f32.gmra.mrb[26].mxu0 %v339_v12  ;;  %774 = vmatmul.mubr.f32.gmra.mrb[26].mxu1 %v371_v13 }
  0xc2   : > { %587 = vmatprep.mubr.f32.mxu0 %v2281_v0  ;;  %779 = vmatprep.mubr.f32.mxu1 %v2281_v0 }
  0xc5   : > { %588 = vmatmul.mubr.f32.gmra.mrb[28].mxu0 %v340_v14  ;;  %780 = vmatmul.mubr.f32.gmra.mrb[28].mxu1 %v372_v15 }
  0xc6   : > { %593 = vmatprep.mubr.f32.mxu0 %v2281_v0  ;;  %785 = vmatprep.mubr.f32.mxu1 %v2281_v0 }
  0xc9   : > { %594 = vmatmul.mubr.f32.gmra.mrb[30].mxu0 %v341_v16  ;;  %786 = vmatmul.mubr.f32.gmra.mrb[30].mxu1 %v373_v17 }
  0xca   : > { %599 = vmatprep.mubr.f32.mxu0 %v2281_v0  ;;  %791 = vmatprep.mubr.f32.mxu1 %v2281_v0 }
  0xcd   : > { %600 = vmatmul.mubr.f32.gmra.mrb[32].mxu0 %v342_v18  ;;  %792 = vmatmul.mubr.f32.gmra.mrb[32].mxu1 %v374_v19 }
  0xce   : > { %605 = vmatprep.mubr.f32.mxu0 %v2281_v0  ;;  %797 = vmatprep.mubr.f32.mxu1 %v2281_v0 }
  0xd1   : > { %606 = vmatmul.mubr.f32.gmra.mrb[34].mxu0 %v343_v20  ;;  %798 = vmatmul.mubr.f32.gmra.mrb[34].mxu1 %v375_v21 }
  0xd2   : > { %611 = vmatprep.mubr.f32.mxu0 %v2281_v0  ;;  %803 = vmatprep.mubr.f32.mxu1 %v2281_v0 }
  0xd5   : > { %612 = vmatmul.mubr.f32.gmra.mrb[36].mxu0 %v344_v22  ;;  %804 = vmatmul.mubr.f32.gmra.mrb[36].mxu1 %v376_v23 }
  0xd6   : > { %617 = vmatprep.mubr.f32.mxu0 %v2281_v0  ;;  %809 = vmatprep.mubr.f32.mxu1 %v2281_v0 }
  0xd9   : > { %618 = vmatmul.mubr.f32.gmra.mrb[38].mxu0 %v345_v24  ;;  %810 = vmatmul.mubr.f32.gmra.mrb[38].mxu1 %v377_v25 }
  0xda   : > { %623 = vmatprep.mubr.f32.mxu0 %v2281_v0  ;;  %815 = vmatprep.mubr.f32.mxu1 %v2281_v0 }
  0xdd   : > { %624 = vmatmul.mubr.f32.gmra.mrb[40].mxu0 %v346_v26  ;;  %816 = vmatmul.mubr.f32.gmra.mrb[40].mxu1 %v378_v27 }
  0xde   : > { %629 = vmatprep.mubr.f32.mxu0 %v2281_v0  ;;  %821 = vmatprep.mubr.f32.mxu1 %v2281_v0 }
  0xe1   : > { %630 = vmatmul.mubr.f32.gmra.mrb[42].mxu0 %v347_v28  ;;  %822 = vmatmul.mubr.f32.gmra.mrb[42].mxu1 %v379_v29  ;;  %v431_v29 = vsub.s32 0, %v430_v8 }
  0xe2   : > { %635 = vmatprep.mubr.f32.mxu0 %v2281_v0  ;;  %827 = vmatprep.mubr.f32.mxu1 %v2281_v0 }
  0xe5   : > { %636 = vmatmul.mubr.f32.gmra.mrb[44].mxu0 %v348_v30  ;;  %828 = vmatmul.mubr.f32.gmra.mrb[44].mxu1 %v380_v31 }
  0xe6   : > { %641 = vmatprep.mubr.f32.mxu0 %v2281_v0  ;;  %833 = vmatprep.mubr.f32.mxu1 %v2281_v0 }
  0xe9   : > { %642 = vmatmul.mubr.f32.gmra.mrb[46].mxu0 %v349_v32  ;;  %834 = vmatmul.mubr.f32.gmra.mrb[46].mxu1 %v381_v33 }
  0xea   : > { %647 = vmatprep.mubr.f32.mxu0 %v2281_v0  ;;  %839 = vmatprep.mubr.f32.mxu1 %v2281_v0 }
  0xed   : > { %648 = vmatmul.mubr.f32.gmra.mrb[48].mxu0 %v350_v34  ;;  %840 = vmatmul.mubr.f32.gmra.mrb[48].mxu1 %v382_v35 }
  0xee   : > { %653 = vmatprep.mubr.f32.mxu0 %v2281_v0  ;;  %845 = vmatprep.mubr.f32.mxu1 %v2281_v0 }
  0xf1   : > { %654 = vmatmul.mubr.f32.gmra.mrb[50].mxu0 %v351_v36  ;;  %846 = vmatmul.mubr.f32.gmra.mrb[50].mxu1 %v383_v37 }
  0xf2   : > { %659 = vmatprep.mubr.f32.mxu0 %v2281_v0  ;;  %851 = vmatprep.mubr.f32.mxu1 %v2281_v0 }
  0xf5   : > { %660 = vmatmul.mubr.f32.gmra.mrb[52].mxu0 %v352_v38  ;;  %852 = vmatmul.mubr.f32.gmra.mrb[52].mxu1 %v384_v39  ;;  %v2581_v38 = vrot.slane %v427_v10, %v431_v29 }
  0xf6   : > { %665 = vmatprep.mubr.f32.mxu0 %v2281_v0  ;;  %857 = vmatprep.mubr.f32.mxu1 %v2281_v0 }
  0xf9   : > { %666 = vmatmul.mubr.f32.gmra.mrb[54].mxu0 %v353_v40  ;;  %858 = vmatmul.mubr.f32.gmra.mrb[54].mxu1 %v385_v41 }
  0xfa   : > { %671 = vmatprep.mubr.f32.mxu0 %v2281_v0  ;;  %863 = vmatprep.mubr.f32.mxu1 %v2281_v0 }
  0xfd   : > { %672 = vmatmul.mubr.f32.gmra.mrb[56].mxu0 %v354_v42  ;;  %864 = vmatmul.mubr.f32.gmra.mrb[56].mxu1 %v386_v43 }
  0xfe   : > { %677 = vmatprep.mubr.f32.mxu0 %v2281_v0  ;;  %869 = vmatprep.mubr.f32.mxu1 %v2281_v0 }
 0x101   : > { %678 = vmatmul.mubr.f32.gmra.mrb[58].mxu0 %v355_v44  ;;  %870 = vmatmul.mubr.f32.gmra.mrb[58].mxu1 %v387_v45 }
 0x102   : > { %683 = vmatprep.mubr.f32.mxu0 %v2281_v0  ;;  %875 = vmatprep.mubr.f32.mxu1 %v2281_v0 }
 0x105   : > { %684 = vmatmul.mubr.f32.gmra.mrb[60].mxu0 %v356_v46  ;;  %876 = vmatmul.mubr.f32.gmra.mrb[60].mxu1 %v388_v47 }
 0x106   : > { %689 = vmatprep.mubr.f32.mxu0 %v2281_v0  ;;  %881 = vmatprep.mubr.f32.mxu1 %v2281_v0 }
 0x109   : > { %690 = vmatmul.mubr.f32.gmra.mrb[62].mxu0 %v357_v48  ;;  %882 = vmatmul.mubr.f32.gmra.mrb[62].mxu1 %v389_v6 }
 0x160   : > { %v505_v12 = vpop.f32.mrb[0].mxu0  ;;  %v697_v13 = vpop.f32.mrb[0].mxu1 }
 0x161   : > { %v507_v14 = vpop.f32.mrb[1].mxu0  ;;  %v699_v15 = vpop.f32.mrb[1].mxu1  ;;  %v2590_v48 = vadd.f32 %v505_v12, %v2581_v38  ;;  %v2593_v10 = vadd.f32 %v697_v13, %v2581_v38 }
 0x162   : > { %v508_v0 = vadd.f32 %v507_v14, %v2567_v11  ;;  %v700_v16 = vadd.f32 %v699_v15, %v2567_v11 }
 0x163   : > { %v888_v29 = vmax.f32 %v2590_v48, 0.0 }
 0x164   : > { %v1681_v17 = vmul.f32 -1.442695, %v508_v0  ;;  %v1713_v18 = vmul.f32 -1.442695, %v700_v16  ;;  %v511_v19 = vpop.f32.mrb[2].mxu0  ;;  %v703_v20 = vpop.f32.mrb[2].mxu1 }
 0x165   : > { %v513_v21 = vpop.f32.mrb[3].mxu0  ;;  %v705_v22 = vpop.f32.mrb[3].mxu1  ;;  %v2605_v13 = vadd.f32 %v703_v20, %v2581_v38 }
 0x166   : > { %1857 = vpow2.f32 %v1681_v17  ;;  %v514_v23 = vadd.f32 %v513_v21, %v2567_v11  ;;  %v706_v24 = vadd.f32 %v705_v22, %v2567_v11  ;;  %v2598_v17 = vadd.f32 %v511_v19, %v2581_v38 }
 0x167   : > { %1859 = vpow2.f32 %v1713_v18 }
 0x168   : > { %v1682_v25 = vmul.f32 -1.442695, %v514_v23  ;;  %v1714_v26 = vmul.f32 -1.442695, %v706_v24  ;;  %v517_v27 = vpop.f32.mrb[4].mxu0  ;;  %v2573_v28 = vpop.f32.mrb[4].mxu1 }
 0x169   : > { %v519_v30 = vpop.f32.mrb[5].mxu0  ;;  %v711_v31 = vpop.f32.mrb[5].mxu1 }
 0x16a   : > { %1861 = vpow2.f32 %v1682_v25  ;;  %v520_v32 = vadd.f32 %v519_v30, %v2567_v11  ;;  %v712_v33 = vadd.f32 %v711_v31, %v2567_v11  ;;  %v920_v30 = vmax.f32 %v2593_v10, 0.0 }
 0x16b   : > { %1863 = vpow2.f32 %v1714_v26  ;;  %v2610_v31 = vadd.f32 %v517_v27, %v2581_v38 }
 0x16c   : > { %v1683_v34 = vmul.f32 -1.442695, %v520_v32  ;;  %v1715_v35 = vmul.f32 -1.442695, %v712_v33  ;;  %v2577_v36 = vpop.f32.mrb[6].mxu0  ;;  %v2579_v37 = vpop.f32.mrb[6].mxu1  ;;  %v1368_v48 = vsub.f32 %v2443_v50, %v920_v30 }
 0x16d   : > { %v525_v39 = vpop.f32.mrb[7].mxu0  ;;  %v717_v40 = vpop.f32.mrb[7].mxu1 }
 0x16e   : > { %1865 = vpow2.f32 %v1683_v34  ;;  %v526_v41 = vadd.f32 %v525_v39, %v2567_v11  ;;  %v718_v42 = vadd.f32 %v717_v40, %v2567_v11  ;;  %v889_v34 = vmax.f32 %v2598_v17, 0.0 }
 0x16f   : > { %1867 = vpow2.f32 %v1715_v35 }
 0x170   : > { %v1858_v43 = vpop.eup %1857  ;;  %v1684_v44 = vmul.f32 -1.442695, %v526_v41  ;;  %v2585_v45 = vpop.f32.mrb[8].mxu0  ;;  %v1716_v7 = vmul.f32 -1.442695, %v718_v42  ;;  %v921_v41 = vmax.f32 %v2605_v13, 0.0 }
 0x171   : > { %v2587_v46 = vpop.f32.mrb[8].mxu1  ;;  %v1860_v47 = vpop.eup %1859  ;;  %v1144_v6 = vadd.f32 1.0, %v1858_v43 }
 0x172   : > { %v531_v8 = vpop.f32.mrb[9].mxu0  ;;  %v723_v9 = vpop.f32.mrb[9].mxu1  ;;  %v1176_v14 = vadd.f32 1.0, %v1860_v47  ;;  %1869 = vpow2.f32 %v1684_v44  ;;  %v1336_v47 = vsub.f32 %v2441_v49, %v888_v29  ;;  %v2633_v49 = vadd.f32 %v2577_v36, %v2581_v38 }
 0x173   : > { %v532_v15 = vadd.f32 %v531_v8, %v2567_v11  ;;  %1871 = vrcp.f32 %v1144_v6  ;;  %v724_v0 = vadd.f32 %v723_v9, %v2567_v11  ;;  %v890_v8 = vmax.f32 %v2610_v31, 0.0 }
 0x174   : > { %v1862_v16 = vpop.eup %1861  ;;  %1873 = vrcp.f32 %v1176_v14  ;;  %v2600_v18 = vpop.f32.mrb[10].mxu0  ;;  %v2625_v9 = vadd.f32 %v2573_v28, %v2581_v38  ;;  %v2645_v36 = vadd.f32 %v2579_v37, %v2581_v38 }
 0x175   : > { %v1685_v12 = vmul.f32 -1.442695, %v532_v15  ;;  %v2602_v21 = vpop.f32.mrb[10].mxu1  ;;  %v1864_v22 = vpop.eup %1863  ;;  %v1145_v23 = vadd.f32 1.0, %v1862_v16  ;;  %1875 = vpow2.f32 %v1716_v7  ;;  %v1717_v24 = vmul.f32 -1.442695, %v724_v0 }
 0x176   : > { %v537_v25 = vpop.f32.mrb[11].mxu0  ;;  %v729_v26 = vpop.f32.mrb[11].mxu1  ;;  %v1177_v19 = vadd.f32 1.0, %v1864_v22  ;;  %v1337_v15 = vsub.f32 %v2449_v51, %v889_v34 }
 0x177   : > { %1877 = vpow2.f32 %v1685_v12  ;;  %v538_v32 = vadd.f32 %v537_v25, %v2567_v11  ;;  %v730_v20 = vadd.f32 %v729_v26, %v2567_v11  ;;  %v1369_v12 = vsub.f32 %v2451_v52, %v921_v41 }
 0x178   : > { %1879 = vrcp.f32 %v1145_v23  ;;  %v1866_v33 = vpop.eup %1865  ;;  %v2615_v35 = vpop.f32.mrb[12].mxu0  ;;  %v922_v52 = vmax.f32 %v2625_v9, 0.0 }
 0x179   : > { %1881 = vrcp.f32 %v1177_v19  ;;  %v2617_v39 = vpop.f32.mrb[12].mxu1  ;;  %v1868_v40 = vpop.eup %1867  ;;  %v1146_v42 = vadd.f32 1.0, %v1866_v33  ;;  %v1686_v43 = vmul.f32 -1.442695, %v538_v32  ;;  %v1718_v7 = vmul.f32 -1.442695, %v730_v20 }
 0x17a   : > { %1883 = vpow2.f32 %v1717_v24  ;;  %v543_v27 = vpop.f32.mrb[13].mxu0  ;;  %v735_v44 = vpop.f32.mrb[13].mxu1  ;;  %v1178_v6 = vadd.f32 1.0, %v1868_v40  ;;  %v1338_v33 = vsub.f32 %v2457_v53, %v890_v8 }
 0x17b   : > { %1885 = vrcp.f32 %v1146_v42  ;;  %v544_v10 = vadd.f32 %v543_v27, %v2567_v11  ;;  %v736_v50 = vadd.f32 %v735_v44, %v2567_v11 }
 0x17c   : > { %v1870_v14 = vpop.eup %1869  ;;  %1887 = vrcp.f32 %v1178_v6  ;;  %v2636_v0 = vpop.f32.mrb[14].mxu0 }
 0x17d   : > { %v2638_v16 = vpop.f32.mrb[14].mxu1  ;;  %v1872_v28 = vpop.eup %1871  ;;  %v1147_v22 = vadd.f32 1.0, %v1870_v14  ;;  %1889 = vpow2.f32 %v1686_v43  ;;  %v1687_v23 = vmul.f32 -1.442695, %v544_v10  ;;  %v1719_v19 = vmul.f32 -1.442695, %v736_v50 }
 0x17e   : > { %v549_v51 = vpop.f32.mrb[15].mxu0  ;;  %v741_v24 = vpop.f32.mrb[15].mxu1  ;;  %v1400_v26 = vmul.f32 %v1872_v28, %v1336_v47  ;;  %1891 = vpow2.f32 %v1718_v7  ;;  %v891_v43 = vmax.f32 %v2633_v49, 0.0  ;;  %v923_v14 = vmax.f32 %v2645_v36, 0.0 }
 0x17f   : > { %v1874_v25 = vpop.eup %1873  ;;  %1893 = vrcp.f32 %v1147_v22  ;;  %v550_v50 = vadd.f32 %v549_v51, %v2567_v11 }
 0x180   : > { %v1876_v32 = vpop.eup %1875  ;;  %v1432_v20 = vmul.f32 %v1874_v25, %v1368_v48  ;;  %v1464_v42 = vadd.f32 %v1400_v26, %v888_v29  ;;  %1895 = vpow2.f32 %v1687_v23  ;;  %v2652_v44 = vpop.f32.mrb[16].mxu0  ;;  %v2658_v48 = vadd.f32 %v2585_v45, %v2581_v38 }
 0x181   : > { %v1878_v40 = vpop.eup %1877  ;;  %v1179_v27 = vadd.f32 1.0, %v1876_v32  ;;  %v2654_v37 = vpop.f32.mrb[16].mxu1  ;;  %1897 = vpow2.f32 %v1719_v19  ;;  %v742_v45 = vadd.f32 %v741_v24, %v2567_v11  ;;  %v1688_v26 = vmul.f32 -1.442695, %v550_v50 }
 0x182   : > { %v1880_v47 = vpop.eup %1879  ;;  %v1496_v6 = vadd.f32 %v1432_v20, %v920_v30  ;;  %v1148_v53 = vadd.f32 1.0, %v1878_v40  ;;  %v555_v7 = vpop.f32.mrb[17].mxu0  ;;  %1528 = vst [vmem:[#allocation7] sm:$0xff] %v1464_v42  ;;  %v2664_v30 = vadd.f32 %v2587_v46, %v2581_v38  ;;  %v1339_v46 = vsub.f32 %v2465_v55, %v891_v43 }
 0x183   : > { %v747_v9 = vpop.f32.mrb[17].mxu1  ;;  %v1882_v10 = vpop.eup %1881  ;;  %v1401_v29 = vmul.f32 %v1880_v47, %v1337_v15  ;;  %1899 = vrcp.f32 %v1179_v27  ;;  %v1370_v15 = vsub.f32 %v2459_v54, %v922_v52  ;;  %v892_v24 = vmax.f32 %v2658_v48, 0.0 }
 0x184   : > { %v1884_v28 = vpop.eup %1883  ;;  %1560 = vst [vmem:[#allocation7 + $0x100] sm:$0xff] %v1496_v6  ;;  %v1433_v22 = vmul.f32 %v1882_v10, %v1369_v12  ;;  %1901 = vrcp.f32 %v1148_v53  ;;  %v2670_v19 = vpop.f32.mrb[18].mxu0  ;;  %v1720_v17 = vmul.f32 -1.442695, %v742_v45  ;;  %v1371_v42 = vsub.f32 %v2467_v56, %v923_v14 }
 0x185   : > { %v1465_v23 = vadd.f32 %v1401_v29, %v889_v34  ;;  %v1180_v25 = vadd.f32 1.0, %v1884_v28  ;;  %v2672_v51 = vpop.f32.mrb[18].mxu1  ;;  %v1886_v32 = vpop.eup %1885  ;;  %v556_v13 = vadd.f32 %v555_v7, %v2567_v11  ;;  %v924_v55 = vmax.f32 %v2664_v30, 0.0 }
 0x186   : > { %v1497_v12 = vadd.f32 %v1433_v22, %v921_v41  ;;  %v561_v34 = vpop.f32.mrb[19].mxu0  ;;  %v753_v20 = vpop.f32.mrb[19].mxu1  ;;  %v1402_v40 = vmul.f32 %v1886_v32, %v1338_v33  ;;  %v748_v47 = vadd.f32 %v747_v9, %v2567_v11  ;;  %v1340_v28 = vsub.f32 %v2473_v57, %v892_v24 }
 0x187   : > { %v1888_v54 = vpop.eup %1887  ;;  %1529 = vst [vmem:[#allocation7 + $0x8] sm:$0xff] %v1465_v23  ;;  %1903 = vrcp.f32 %v1180_v25  ;;  %v1689_v10 = vmul.f32 -1.442695, %v556_v13  ;;  %v2697_v9 = vadd.f32 %v2600_v18, %v2581_v38 }
 0x188   : > { %v1890_v41 = vpop.eup %1889  ;;  %1561 = vst [vmem:[#allocation7 + $0x108] sm:$0xff] %v1497_v12  ;;  %v1434_v27 = vmul.f32 %v1888_v54, %v1370_v15  ;;  %1905 = vpow2.f32 %v1688_v26  ;;  %v1466_v53 = vadd.f32 %v1402_v40, %v890_v8  ;;  %v2688_v29 = vpop.f32.mrb[20].mxu0  ;;  %v2701_v15 = vadd.f32 %v2602_v21, %v2581_v38 }
 0x189   : > { %v1892_v6 = vpop.eup %1891  ;;  %v1149_v33 = vadd.f32 1.0, %v1890_v41  ;;  %1907 = vpow2.f32 %v1720_v17  ;;  %v2690_v56 = vpop.f32.mrb[20].mxu1  ;;  %v1721_v25 = vmul.f32 -1.442695, %v748_v47  ;;  %v562_v26 = vadd.f32 %v561_v34, %v2567_v11 }
 0x18a   : > { %v1894_v7 = vpop.eup %1893  ;;  %v1498_v50 = vadd.f32 %v1434_v27, %v922_v52  ;;  %v1181_v22 = vadd.f32 1.0, %v1892_v6  ;;  %v567_v31 = vpop.f32.mrb[21].mxu0  ;;  %1530 = vst [vmem:[#allocation7 + $0x10] sm:$0xff] %v1466_v53  ;;  %v2705_v52 = vadd.f32 %v2615_v35, %v2581_v38  ;;  %v2712_v21 = vadd.f32 %v2617_v39, %v2581_v38 }
 0x18b   : > { %v759_v8 = vpop.f32.mrb[21].mxu1  ;;  %v1896_v45 = vpop.eup %1895  ;;  %v1403_v23 = vmul.f32 %v1894_v7, %v1339_v46  ;;  %1909 = vrcp.f32 %v1149_v33  ;;  %v893_v13 = vmax.f32 %v2697_v9, 0.0  ;;  %v1690_v34 = vmul.f32 -1.442695, %v562_v26 }
 0x18c   : > { %v1898_v57 = vpop.eup %1897  ;;  %1562 = vst [vmem:[#allocation7 + $0x110] sm:$0xff] %v1498_v50  ;;  %1911 = vrcp.f32 %v1181_v22  ;;  %v1150_v18 = vadd.f32 1.0, %v1896_v45  ;;  %v2714_v17 = vpop.f32.mrb[22].mxu0  ;;  %v754_v39 = vadd.f32 %v753_v20, %v2567_v11  ;;  %v894_v6 = vmax.f32 %v2705_v52, 0.0 }
 0x18d   : > { %v1900_v32 = vpop.eup %1899  ;;  %v1467_v12 = vadd.f32 %v1403_v23, %v891_v43  ;;  %v1182_v46 = vadd.f32 1.0, %v1898_v57  ;;  %1913 = vpow2.f32 %v1689_v10  ;;  %v2716_v35 = vpop.f32.mrb[22].mxu1  ;;  %v925_v43 = vmax.f32 %v2701_v15, 0.0 }
 0x18e   : > { %v1902_v54 = vpop.eup %1901  ;;  %v1435_v40 = vmul.f32 %v1900_v32, %v1371_v42  ;;  %1915 = vrcp.f32 %v1150_v18  ;;  %v573_v41 = vpop.f32.mrb[23].mxu0  ;;  %v1372_v42 = vsub.f32 %v2475_v58, %v924_v55  ;;  %v926_v10 = vmax.f32 %v2712_v21, 0.0 }
 0x18f   : > { %v765_v27 = vpop.f32.mrb[23].mxu1  ;;  %1531 = vst [vmem:[#allocation7 + $0x18] sm:$0xff] %v1467_v12  ;;  %v1404_v49 = vmul.f32 %v1902_v54, %v1340_v28  ;;  %1917 = vrcp.f32 %v1182_v46  ;;  %v1722_v7 = vmul.f32 -1.442695, %v754_v39  ;;  %v568_v58 = vadd.f32 %v567_v31, %v2567_v11 }
 0x190   : > { %v1499_v47 = vadd.f32 %v1435_v40, %v923_v14  ;;  %1919 = vpow2.f32 %v1721_v25  ;;  %v2730_v50 = vpop.f32.mrb[24].mxu0  ;;  %v2732_v20 = vpop.f32.mrb[24].mxu1  ;;  %v760_v28 = vadd.f32 %v759_v8, %v2567_v11  ;;  %v1373_v45 = vsub.f32 %v2483_v60, %v925_v43 }
 0x191   : > { %v1904_v53 = vpop.eup %1903  ;;  %v1468_v33 = vadd.f32 %v1404_v49, %v892_v24  ;;  %1921 = vpow2.f32 %v1690_v34  ;;  %v2736_v9 = vpop.f32.mrb[25].mxu0  ;;  %v1341_v24 = vsub.f32 %v2481_v59, %v893_v13  ;;  %v1342_v31 = vsub.f32 %v2489_v61, %v894_v6 }
 0x192   : > { %v1906_v36 = vpop.eup %1905  ;;  %1563 = vst [vmem:[#allocation7 + $0x118] sm:$0xff] %v1499_v47  ;;  %v1436_v14 = vmul.f32 %v1904_v53, %v1372_v42  ;;  %v2738_v22 = vpop.f32.mrb[25].mxu1  ;;  %1923 = vpow2.f32 %v1722_v7  ;;  %v1691_v57 = vmul.f32 -1.442695, %v568_v58  ;;  %v1374_v25 = vsub.f32 %v2491_v62, %v926_v10 }
 0x193   : > { %v1908_v48 = vpop.eup %1907  ;;  %1532 = vst [vmem:[#allocation7 + $0x20] sm:$0xff] %v1468_v33  ;;  %v1151_v23 = vadd.f32 1.0, %v1906_v36  ;;  %v2752_v59 = vadd.f32 %v2636_v0, %v2581_v38  ;;  %v1723_v60 = vmul.f32 -1.442695, %v760_v28  ;;  %v2760_v32 = vadd.f32 %v2638_v16, %v2581_v38 }
 0x194   : > { %v1500_v15 = vadd.f32 %v1436_v14, %v924_v55  ;;  %v1183_v8 = vadd.f32 1.0, %v1908_v48  ;;  %v2754_v26 = vpop.f32.mrb[26].mxu0  ;;  %v2756_v30 = vpop.f32.mrb[26].mxu1  ;;  %v574_v62 = vadd.f32 %v573_v41, %v2567_v11  ;;  %v2767_v40 = vadd.f32 %v2652_v44, %v2581_v38 }
 0x195   : > { %v1910_v18 = vpop.eup %1909  ;;  %1925 = vrcp.f32 %v1151_v23  ;;  %v585_v12 = vpop.f32.mrb[27].mxu0  ;;  %v766_v34 = vadd.f32 %v765_v27, %v2567_v11  ;;  %v2772_v16 = vadd.f32 %v2654_v37, %v2581_v38  ;;  %v927_v58 = vmax.f32 %v2760_v32, 0.0 }
 0x196   : > { %v1912_v55 = vpop.eup %1911  ;;  %1564 = vst [vmem:[#allocation7 + $0x120] sm:$0xff] %v1500_v15  ;;  %v1405_v61 = vmul.f32 %v1910_v18, %v1341_v24  ;;  %1927 = vrcp.f32 %v1183_v8  ;;  %v2763_v46 = vpop.f32.mrb[27].mxu1  ;;  %v1692_v33 = vmul.f32 -1.442695, %v574_v62  ;;  %v896_v15 = vmax.f32 %v2767_v40, 0.0 }
 0x197   : > { %v1914_v0 = vpop.eup %1913  ;;  %v1437_v54 = vmul.f32 %v1912_v55, %v1373_v45  ;;  %1929 = vpow2.f32 %v1691_v57  ;;  %v1724_v7 = vmul.f32 -1.442695, %v766_v34  ;;  %v2788_v45 = vadd.f32 %v2670_v19, %v2581_v38 }
 0x198   : > { %v1916_v49 = vpop.eup %1915  ;;  %v1469_v39 = vadd.f32 %v1405_v61, %v893_v13  ;;  %v1152_v47 = vadd.f32 1.0, %v1914_v0  ;;  %1931 = vpow2.f32 %v1723_v60  ;;  %v2774_v36 = vpop.f32.mrb[28].mxu0  ;;  %v895_v13 = vmax.f32 %v2752_v59, 0.0 }
 0x199   : > { %v1918_v41 = vpop.eup %1917  ;;  %v1501_v42 = vadd.f32 %v1437_v54, %v925_v43  ;;  %v1406_v53 = vmul.f32 %v1916_v49, %v1342_v31  ;;  %v2776_v44 = vpop.f32.mrb[28].mxu1  ;;  %v928_v57 = vmax.f32 %v2772_v16, 0.0  ;;  %v580_v52 = vadd.f32 %v2736_v9, %v2567_v11 }
 0x19a   : > { %v1920_v14 = vpop.eup %1919  ;;  %1533 = vst [vmem:[#allocation7 + $0x28] sm:$0xff] %v1469_v39  ;;  %v1438_v27 = vmul.f32 %v1918_v41, %v1374_v25  ;;  %1933 = vrcp.f32 %v1152_v47  ;;  %v2780_v37 = vpop.f32.mrb[29].mxu0  ;;  %v772_v19 = vadd.f32 %v2738_v22, %v2567_v11  ;;  %v1343_v21 = vsub.f32 %v2497_v63, %v895_v13 }
 0x19b   : > { %v2782_v28 = vpop.f32.mrb[29].mxu1  ;;  %v1922_v43 = vpop.eup %1921  ;;  %1565 = vst [vmem:[#allocation7 + $0x128] sm:$0xff] %v1501_v42  ;;  %v1470_v48 = vadd.f32 %v1406_v53, %v894_v6  ;;  %v1184_v24 = vadd.f32 1.0, %v1920_v14  ;;  %1935 = vpow2.f32 %v1692_v33  ;;  %v1375_v22 = vsub.f32 %v2499_v1, %v927_v58 }
 0x19c   : > { %v1502_v23 = vadd.f32 %v1438_v27, %v926_v10  ;;  %v1153_v31 = vadd.f32 1.0, %v1922_v43  ;;  %1937 = vpow2.f32 %v1724_v7  ;;  %v1924_v8 = vpop.eup %1923  ;;  %v2798_v6 = vpop.f32.mrb[30].mxu0  ;;  %v2805_v10 = vadd.f32 %v2672_v51, %v2581_v38 }
 0x19d   : > { %1534 = vst [vmem:[#allocation7 + $0x30] sm:$0xff] %v1470_v48  ;;  %1939 = vrcp.f32 %v1184_v24  ;;  %v2800_v18 = vpop.f32.mrb[30].mxu1  ;;  %v1185_v25 = vadd.f32 1.0, %v1924_v8  ;;  %v2807_v59 = vpop.f32.mrb[31].mxu0  ;;  %v897_v55 = vmax.f32 %v2788_v45, 0.0  ;;  %v1344_v63 = vsub.f32 %v2505_v2, %v896_v15 }
 0x19e   : > { %1566 = vst [vmem:[#allocation7 + $0x130] sm:$0xff] %v1502_v23  ;;  %1941 = vrcp.f32 %v1153_v31  ;;  %v2809_v60 = vpop.f32.mrb[31].mxu1  ;;  %v1693_v61 = vmul.f32 -1.442695, %v580_v52  ;;  %v1725_v32 = vmul.f32 -1.442695, %v772_v19  ;;  %v586_v51 = vadd.f32 %v585_v12, %v2567_v11 }
 0x19f   : > { %v1926_v9 = vpop.eup %1925  ;;  %1943 = vrcp.f32 %v1185_v25  ;;  %v1376_v49 = vsub.f32 %v2507_v3, %v928_v57  ;;  %v778_v1 = vadd.f32 %v2763_v46, %v2567_v11  ;;  %v929_v2 = vmax.f32 %v2805_v10, 0.0 }
 0x1a0   : > { %v1928_v62 = vpop.eup %1927  ;;  %v1407_v0 = vmul.f32 %v1926_v9, %v1343_v21  ;;  %1945 = vpow2.f32 %v1693_v61  ;;  %v2822_v39 = vpop.f32.mrb[32].mxu0  ;;  %v1345_v3 = vsub.f32 %v2513_v4, %v897_v55  ;;  %v1694_v14 = vmul.f32 -1.442695, %v586_v51 }
 0x1a1   : > { %v1930_v54 = vpop.eup %1929  ;;  %v1439_v34 = vmul.f32 %v1928_v62, %v1375_v22  ;;  %v2824_v47 = vpop.f32.mrb[32].mxu1  ;;  %1947 = vpow2.f32 %v1725_v32  ;;  %v2840_v43 = vadd.f32 %v2690_v56, %v2581_v38  ;;  %v1726_v48 = vmul.f32 -1.442695, %v778_v1 }
 0x1a2   : > { %v1932_v41 = vpop.eup %1931  ;;  %v1471_v42 = vadd.f32 %v1407_v0, %v895_v13  ;;  %v1154_v53 = vadd.f32 1.0, %v1930_v54  ;;  %v2827_v12 = vpop.f32.mrb[33].mxu0  ;;  %v2836_v13 = vadd.f32 %v2688_v29, %v2581_v38  ;;  %v592_v4 = vadd.f32 %v2780_v37, %v2567_v11 }
 0x1a3   : > { %v2829_v33 = vpop.f32.mrb[33].mxu1  ;;  %v1503_v7 = vadd.f32 %v1439_v34, %v927_v58  ;;  %v1186_v46 = vadd.f32 1.0, %v1932_v41  ;;  %v784_v23 = vadd.f32 %v2782_v28, %v2567_v11  ;;  %v1377_v56 = vsub.f32 %v2515_v5, %v929_v2 }
 0x1a4   : > { %v1934_v27 = vpop.eup %1933  ;;  %1535 = vst [vmem:[#allocation7 + $0x38] sm:$0xff] %v1471_v42  ;;  %1949 = vrcp.f32 %v1154_v53  ;;  %v2846_v31 = vpop.f32.mrb[34].mxu0  ;;  %v2855_v52 = vadd.f32 %v2714_v17, %v2581_v38  ;;  %v1695_v22 = vmul.f32 -1.442695, %v592_v4  ;;  %v898_v5 = vmax.f32 %v2836_v13, 0.0 }
 0x1a5   : > { %v1936_v24 = vpop.eup %1935  ;;  %1567 = vst [vmem:[#allocation7 + $0x138] sm:$0xff] %v1503_v7  ;;  %v1408_v58 = vmul.f32 %v1934_v27, %v1344_v63  ;;  %1951 = vrcp.f32 %v1186_v46  ;;  %v2848_v29 = vpop.f32.mrb[34].mxu1  ;;  %v2866_v17 = vadd.f32 %v2716_v35, %v2581_v38  ;;  %v930_v0 = vmax.f32 %v2840_v43, 0.0 }
 0x1a6   : > { %v1938_v8 = vpop.eup %1937  ;;  %v1155_v19 = vadd.f32 1.0, %v1936_v24  ;;  %1953 = vpow2.f32 %v1694_v14  ;;  %v2857_v21 = vpop.f32.mrb[35].mxu0  ;;  %v1727_v63 = vmul.f32 -1.442695, %v784_v23  ;;  %v2877_v34 = vadd.f32 %v2730_v50, %v2581_v38  ;;  %v2113_v14 = vld [vmem:[#allocation7 + $0x50] sm:$0xff] }
 0x1a7   : > { %v2859_v37 = vpop.f32.mrb[35].mxu1  ;;  %v1940_v28 = vpop.eup %1939  ;;  %v1472_v25 = vadd.f32 %v1408_v58, %v896_v15  ;;  %v1187_v9 = vadd.f32 1.0, %v1938_v8  ;;  %1955 = vpow2.f32 %v1726_v48  ;;  %v598_v35 = vadd.f32 %v2807_v59, %v2567_v11  ;;  %v2114_v24 = vld [vmem:[#allocation7 + $0x150] sm:$0xff]  ;;  %v2115_v8 = vld [vmem:[#allocation7 + $0x58] sm:$0xff] }
 0x1a8   : > { %v1942_v61 = vpop.eup %1941  ;;  %v1440_v32 = vmul.f32 %v1940_v28, %v1376_v49  ;;  %1957 = vrcp.f32 %v1155_v19  ;;  %v2869_v40 = vpop.f32.mrb[36].mxu0  ;;  %v899_v16 = vmax.f32 %v2855_v52, 0.0  ;;  %v931_v50 = vmax.f32 %v2866_v17, 0.0 }
 0x1a9   : > { %1536 = vst [vmem:[#allocation7 + $0x40] sm:$0xff] %v1472_v25  ;;  %v1409_v62 = vmul.f32 %v1942_v61, %v1345_v3  ;;  %1959 = vrcp.f32 %v1187_v9  ;;  %v2871_v15 = vpop.f32.mrb[36].mxu1  ;;  %v1944_v51 = vpop.eup %1943  ;;  %v1696_v3 = vmul.f32 -1.442695, %v598_v35  ;;  %v790_v59 = vadd.f32 %v2809_v60, %v2567_v11  ;;  %v2116_v9 = vld [vmem:[#allocation7 + $0x158] sm:$0xff] }
 0x1aa   : > { %v1504_v54 = vadd.f32 %v1440_v32, %v928_v57  ;;  %1961 = vpow2.f32 %v1695_v22  ;;  %v2881_v49 = vpop.f32.mrb[37].mxu0  ;;  %v2883_v1 = vpop.f32.mrb[37].mxu1  ;;  %v1441_v53 = vmul.f32 %v1944_v51, %v1377_v56  ;;  %v1346_v45 = vsub.f32 %v2113_v14, %v898_v5 }
 0x1ab   : > { %v1946_v41 = vpop.eup %1945  ;;  %v1473_v42 = vadd.f32 %v1409_v62, %v897_v55  ;;  %1963 = vpow2.f32 %v1727_v63  ;;  %v2895_v55 = vadd.f32 %v2732_v20, %v2581_v38  ;;  %v1378_v58 = vsub.f32 %v2114_v24, %v930_v0 }
 0x1ac   : > { %v1948_v57 = vpop.eup %1947  ;;  %1568 = vst [vmem:[#allocation7 + $0x140] sm:$0xff] %v1504_v54  ;;  %v1156_v7 = vadd.f32 1.0, %v1946_v41  ;;  %v1505_v46 = vadd.f32 %v1441_v53, %v929_v2  ;;  %v2897_v13 = vpop.f32.mrb[38].mxu0  ;;  %v900_v60 = vmax.f32 %v2877_v34, 0.0  ;;  %v1728_v4 = vmul.f32 -1.442695, %v790_v59 }
 0x1ad   : > { %1537 = vst [vmem:[#allocation7 + $0x48] sm:$0xff] %v1473_v42  ;;  %v1188_v27 = vadd.f32 1.0, %v1948_v57  ;;  %v2899_v43 = vpop.f32.mrb[38].mxu1  ;;  %v2902_v10 = vpop.f32.mrb[39].mxu0  ;;  %v1347_v56 = vsub.f32 %v2115_v8, %v899_v16  ;;  %v604_v19 = vadd.f32 %v2827_v12, %v2567_v11  ;;  %v1379_v22 = vsub.f32 %v2116_v9, %v931_v50  ;;  %v2117_v42 = vld [vmem:[#allocation7 + $0x60] sm:$0xff] }
 0x1ae   : > { %v1950_v48 = vpop.eup %1949  ;;  %1965 = vrcp.f32 %v1156_v7  ;;  %v2904_v2 = vpop.f32.mrb[39].mxu1  ;;  %1569 = vst [vmem:[#allocation7 + $0x148] sm:$0xff] %v1505_v46  ;;  %v796_v61 = vadd.f32 %v2829_v33, %v2567_v11  ;;  %v932_v63 = vmax.f32 %v2895_v55, 0.0  ;;  %v1348_v53 = vsub.f32 %v2117_v42, %v900_v60 }
 0x1af   : > { %v1952_v23 = vpop.eup %1951  ;;  %v1410_v20 = vmul.f32 %v1950_v48, %v1346_v45  ;;  %1967 = vrcp.f32 %v1188_v27  ;;  %v1697_v7 = vmul.f32 -1.442695, %v604_v19  ;;  %v2927_v46 = vadd.f32 %v2754_v26, %v2581_v38 }
 0x1b0   : > { %v1954_v28 = vpop.eup %1953  ;;  %v1442_v25 = vmul.f32 %v1952_v23, %v1378_v58  ;;  %1969 = vpow2.f32 %v1696_v3  ;;  %v2915_v54 = vpop.f32.mrb[40].mxu0  ;;  %v1729_v14 = vmul.f32 -1.442695, %v796_v61  ;;  %v2931_v27 = vadd.f32 %v2756_v30, %v2581_v38 }
 0x1b1   : > { %v1956_v32 = vpop.eup %1955  ;;  %v1474_v62 = vadd.f32 %v1410_v20, %v898_v5  ;;  %v1157_v51 = vadd.f32 1.0, %v1954_v28  ;;  %1971 = vpow2.f32 %v1728_v4  ;;  %v2917_v35 = vpop.f32.mrb[40].mxu1  ;;  %v610_v48 = vadd.f32 %v2857_v21, %v2567_v11  ;;  %v2118_v4 = vld [vmem:[#allocation7 + $0x160] sm:$0xff] }
 0x1b2   : > { %v1958_v12 = vpop.eup %1957  ;;  %v1506_v41 = vadd.f32 %v1442_v25, %v930_v0  ;;  %v1189_v57 = vadd.f32 1.0, %v1956_v32  ;;  %v2921_v3 = vpop.f32.mrb[41].mxu0  ;;  %v1380_v26 = vsub.f32 %v2118_v4, %v932_v63  ;;  %v2947_v21 = vadd.f32 %v2774_v36, %v2581_v38 }
 0x1b3   : > { %v2923_v33 = vpop.f32.mrb[41].mxu1  ;;  %v1960_v5 = vpop.eup %1959  ;;  %1538 = vst [vmem:[#allocation7 + $0x50] sm:$0xff] %v1474_v62  ;;  %v1411_v59 = vmul.f32 %v1958_v12, %v1347_v56  ;;  %1973 = vrcp.f32 %v1157_v51  ;;  %v901_v19 = vmax.f32 %v2927_v46, 0.0  ;;  %v1698_v28 = vmul.f32 -1.442695, %v610_v48 }
 0x1b4   : > { %v1962_v0 = vpop.eup %1961  ;;  %1570 = vst [vmem:[#allocation7 + $0x150] sm:$0xff] %v1506_v41  ;;  %v1443_v45 = vmul.f32 %v1960_v5, %v1379_v22  ;;  %1975 = vrcp.f32 %v1189_v57  ;;  %v2939_v20 = vpop.f32.mrb[42].mxu0  ;;  %v802_v25 = vadd.f32 %v2859_v37, %v2567_v11  ;;  %v2959_v36 = vadd.f32 %v2776_v44, %v2581_v38 }
 0x1b5   : > { %v1964_v24 = vpop.eup %1963  ;;  %v1475_v58 = vadd.f32 %v1411_v59, %v899_v16  ;;  %v1158_v23 = vadd.f32 1.0, %v1962_v0  ;;  %1977 = vpow2.f32 %v1697_v7  ;;  %v2941_v8 = vpop.f32.mrb[42].mxu1  ;;  %v2963_v9 = vadd.f32 %v2798_v6, %v2581_v38  ;;  %v2120_v0 = vld [vmem:[#allocation7 + $0x168] sm:$0xff] }
 0x1b6   : > { %v1507_v30 = vadd.f32 %v1443_v45, %v931_v50  ;;  %v1190_v56 = vadd.f32 1.0, %v1964_v24  ;;  %1979 = vpow2.f32 %v1729_v14  ;;  %v2949_v52 = vpop.f32.mrb[43].mxu0  ;;  %v2951_v16 = vpop.f32.mrb[43].mxu1  ;;  %v933_v50 = vmax.f32 %v2931_v27, 0.0  ;;  %v2119_v14 = vld [vmem:[#allocation7 + $0x68] sm:$0xff] }
 0x1b7   : > { %1539 = vst [vmem:[#allocation7 + $0x58] sm:$0xff] %v1475_v58  ;;  %1981 = vrcp.f32 %v1158_v23  ;;  %v1730_v32 = vmul.f32 -1.442695, %v802_v25  ;;  %v616_v37 = vadd.f32 %v2881_v49, %v2567_v11  ;;  %v902_v44 = vmax.f32 %v2947_v21, 0.0  ;;  %v2121_v25 = vld [vmem:[#allocation7 + $0x70] sm:$0xff] }
 0x1b8   : > { %v1966_v17 = vpop.eup %1965  ;;  %1571 = vst [vmem:[#allocation7 + $0x158] sm:$0xff] %v1507_v30  ;;  %1983 = vrcp.f32 %v1190_v56  ;;  %v2967_v62 = vpop.f32.mrb[44].mxu0  ;;  %v2974_v42 = vadd.f32 %v2800_v18, %v2581_v38  ;;  %v808_v6 = vadd.f32 %v2883_v1, %v2567_v11  ;;  %v1349_v18 = vsub.f32 %v2119_v14, %v901_v19 }
 0x1b9   : > { %v1968_v22 = vpop.eup %1967  ;;  %v1412_v61 = vmul.f32 %v1966_v17, %v1348_v53  ;;  %1985 = vpow2.f32 %v1698_v28  ;;  %v2969_v51 = vpop.f32.mrb[44].mxu1  ;;  %v1699_v59 = vmul.f32 -1.442695, %v616_v37  ;;  %v1381_v45 = vsub.f32 %v2120_v0, %v933_v50 }
 0x1ba   : > { %v1970_v12 = vpop.eup %1969  ;;  %v1444_v41 = vmul.f32 %v1968_v22, %v1380_v26  ;;  %v2978_v53 = vpop.f32.mrb[45].mxu0  ;;  %1987 = vpow2.f32 %v1730_v32  ;;  %v934_v48 = vmax.f32 %v2959_v36, 0.0  ;;  %v903_v24 = vmax.f32 %v2963_v9, 0.0 }
 0x1bb   : > { %v2980_v57 = vpop.f32.mrb[45].mxu1  ;;  %v1972_v49 = vpop.eup %1971  ;;  %v1476_v7 = vadd.f32 %v1412_v61, %v900_v60  ;;  %v1159_v5 = vadd.f32 1.0, %v1970_v12  ;;  %v1731_v34 = vmul.f32 -1.442695, %v808_v6  ;;  %v814_v26 = vadd.f32 %v2904_v2, %v2567_v11  ;;  %v2122_v12 = vld [vmem:[#allocation7 + $0x170] sm:$0xff]  ;;  %v2123_v6 = vld [vmem:[#allocation7 + $0x78] sm:$0xff] }
 0x1bc   : > { %v1508_v46 = vadd.f32 %v1444_v41, %v932_v63  ;;  %v1191_v27 = vadd.f32 1.0, %v1972_v49  ;;  %v2988_v60 = vpop.f32.mrb[46].mxu0  ;;  %v2990_v58 = vpop.f32.mrb[46].mxu1  ;;  %v622_v63 = vadd.f32 %v2902_v10, %v2567_v11  ;;  %v1350_v17 = vsub.f32 %v2121_v25, %v902_v44 }
 0x1bd   : > { %v1974_v1 = vpop.eup %1973  ;;  %1540 = vst [vmem:[#allocation7 + $0x60] sm:$0xff] %v1476_v7  ;;  %1989 = vrcp.f32 %v1159_v5  ;;  %v2996_v23 = vpop.f32.mrb[47].mxu0  ;;  %v935_v36 = vmax.f32 %v2974_v42, 0.0  ;;  %v1382_v41 = vsub.f32 %v2122_v12, %v934_v48  ;;  %v1351_v49 = vsub.f32 %v2123_v6, %v903_v24 }
 0x1be   : > { %v1976_v4 = vpop.eup %1975  ;;  %1572 = vst [vmem:[#allocation7 + $0x160] sm:$0xff] %v1508_v46  ;;  %v1413_v55 = vmul.f32 %v1974_v1, %v1349_v18  ;;  %1991 = vrcp.f32 %v1191_v27  ;;  %v2998_v30 = vpop.f32.mrb[47].mxu1  ;;  %v1700_v10 = vmul.f32 -1.442695, %v622_v63  ;;  %v3019_v1 = vadd.f32 %v2824_v47, %v2581_v38 }
 0x1bf   : > { %v1978_v56 = vpop.eup %1977  ;;  %v1445_v28 = vmul.f32 %v1976_v4, %v1381_v45  ;;  %1993 = vpow2.f32 %v1699_v59  ;;  %v2124_v4 = vld [vmem:[#allocation7 + $0x178] sm:$0xff]  ;;  %v634_v12 = vadd.f32 %v2949_v52, %v2567_v11  ;;  %v640_v42 = vadd.f32 %v2978_v53, %v2567_v11 }
 0x1c0   : > { %v1980_v22 = vpop.eup %1979  ;;  %v1477_v61 = vadd.f32 %v1413_v55, %v901_v19  ;;  %v1160_v32 = vadd.f32 1.0, %v1978_v56  ;;  %1995 = vpow2.f32 %v1731_v34  ;;  %v3005_v5 = vpop.f32.mrb[48].mxu0  ;;  %v3011_v19 = vadd.f32 %v2822_v39, %v2581_v38 }
 0x1c1   : > { %v1982_v37 = vpop.eup %1981  ;;  %v1509_v2 = vadd.f32 %v1445_v28, %v933_v50  ;;  %v1192_v7 = vadd.f32 1.0, %v1980_v22  ;;  %v3007_v46 = vpop.f32.mrb[48].mxu1  ;;  %v1732_v50 = vmul.f32 -1.442695, %v814_v26  ;;  %v628_v34 = vadd.f32 %v2921_v3, %v2567_v11 }
 0x1c2   : > { %v1984_v14 = vpop.eup %1983  ;;  %1541 = vst [vmem:[#allocation7 + $0x68] sm:$0xff] %v1477_v61  ;;  %v1414_v59 = vmul.f32 %v1982_v37, %v1350_v17  ;;  %1997 = vrcp.f32 %v1160_v32  ;;  %v3013_v18 = vpop.f32.mrb[49].mxu0  ;;  %v1383_v55 = vsub.f32 %v2124_v4, %v935_v36  ;;  %v3029_v28 = vadd.f32 %v2846_v31, %v2581_v38 }
 0x1c3   : > { %v3015_v0 = vpop.f32.mrb[49].mxu1  ;;  %v1986_v45 = vpop.eup %1985  ;;  %1573 = vst [vmem:[#allocation7 + $0x168] sm:$0xff] %v1509_v2  ;;  %v1446_v27 = vmul.f32 %v1984_v14, %v1382_v41  ;;  %1999 = vrcp.f32 %v1192_v7  ;;  %v1701_v47 = vmul.f32 -1.442695, %v628_v34  ;;  %v904_v21 = vmax.f32 %v3011_v19, 0.0  ;;  %v2126_v34 = vld [vmem:[#allocation7 + $0x180] sm:$0xff] }
 0x1c4   : > { %v1478_v39 = vadd.f32 %v1414_v59, %v902_v44  ;;  %v1161_v63 = vadd.f32 1.0, %v1986_v45  ;;  %2001 = vpow2.f32 %v1700_v10  ;;  %v1988_v26 = vpop.eup %1987  ;;  %v3031_v25 = vpop.f32.mrb[50].mxu0  ;;  %v820_v17 = vadd.f32 %v2923_v33, %v2567_v11 }
 0x1c5   : > { %v1510_v56 = vadd.f32 %v1446_v27, %v934_v48  ;;  %2003 = vpow2.f32 %v1732_v50  ;;  %v3033_v3 = vpop.f32.mrb[50].mxu1  ;;  %v1193_v44 = vadd.f32 1.0, %v1988_v26  ;;  %v3038_v22 = vpop.f32.mrb[51].mxu0  ;;  %v936_v61 = vmax.f32 %v3019_v1, 0.0  ;;  %v2125_v1 = vld [vmem:[#allocation7 + $0x80] sm:$0xff] }
 0x1c6   : > { %1542 = vst [vmem:[#allocation7 + $0x70] sm:$0xff] %v1478_v39  ;;  %2005 = vrcp.f32 %v1161_v63  ;;  %v3040_v48 = vpop.f32.mrb[51].mxu1  ;;  %v3045_v32 = vadd.f32 %v2848_v29, %v2581_v38  ;;  %v3049_v10 = vadd.f32 %v2869_v40, %v2581_v38  ;;  %v1733_v33 = vmul.f32 -1.442695, %v820_v17 }
 0x1c7   : > { %v1990_v31 = vpop.eup %1989  ;;  %1574 = vst [vmem:[#allocation7 + $0x170] sm:$0xff] %v1510_v56  ;;  %2007 = vpow2.f32 %v1701_v47  ;;  %v905_v7 = vmax.f32 %v3029_v28, 0.0  ;;  %v3056_v29 = vadd.f32 %v2871_v15, %v2581_v38  ;;  %v826_v40 = vadd.f32 %v2951_v16, %v2567_v11 }
 0x1c8   : > { %v1992_v37 = vpop.eup %1991  ;;  %v1415_v2 = vmul.f32 %v1990_v31, %v1351_v49  ;;  %2009 = vrcp.f32 %v1193_v44  ;;  %v3060_v14 = vpop.f32.mrb[52].mxu0  ;;  %v1702_v50 = vmul.f32 -1.442695, %v634_v12  ;;  %v1352_v16 = vsub.f32 %v2125_v1, %v904_v21 }
 0x1c9   : > { %v1994_v41 = vpop.eup %1993  ;;  %v1447_v6 = vmul.f32 %v1992_v37, %v1383_v55  ;;  %v3062_v59 = vpop.f32.mrb[52].mxu1  ;;  %2011 = vpow2.f32 %v1733_v33  ;;  %v1384_v39 = vsub.f32 %v2126_v34, %v936_v61  ;;  %v937_v9 = vmax.f32 %v3045_v32, 0.0  ;;  %v2127_v32 = vld [vmem:[#allocation7 + $0x88] sm:$0xff] }
 0x1ca   : > { %v1996_v49 = vpop.eup %1995  ;;  %v1479_v19 = vadd.f32 %v1415_v2, %v903_v24  ;;  %v1162_v52 = vadd.f32 1.0, %v1994_v41  ;;  %v3066_v45 = vpop.f32.mrb[53].mxu0  ;;  %v906_v24 = vmax.f32 %v3049_v10, 0.0  ;;  %v1734_v63 = vmul.f32 -1.442695, %v826_v40 }
 0x1cb   : > { %v3068_v27 = vpop.f32.mrb[53].mxu1  ;;  %v1511_v15 = vadd.f32 %v1447_v6, %v935_v36  ;;  %v1194_v4 = vadd.f32 1.0, %v1996_v49  ;;  %v832_v36 = vadd.f32 %v2980_v57, %v2567_v11  ;;  %v1353_v37 = vsub.f32 %v2127_v32, %v905_v7 }
 0x1cc   : > { %v1998_v55 = vpop.eup %1997  ;;  %1543 = vst [vmem:[#allocation7 + $0x78] sm:$0xff] %v1479_v19  ;;  %2013 = vrcp.f32 %v1162_v52  ;;  %v3078_v47 = vpop.f32.mrb[54].mxu0  ;;  %v938_v2 = vmax.f32 %v3056_v29, 0.0  ;;  %v1703_v6 = vmul.f32 -1.442695, %v640_v42  ;;  %v2128_v19 = vld [vmem:[#allocation7 + $0x188] sm:$0xff]  ;;  %v3121_v28 = vadd.f32 %v2917_v35, %v2581_v38 }
 0x1cd   : > { %v2000_v26 = vpop.eup %1999  ;;  %1575 = vst [vmem:[#allocation7 + $0x178] sm:$0xff] %v1511_v15  ;;  %v1416_v56 = vmul.f32 %v1998_v55, %v1352_v16  ;;  %2015 = vrcp.f32 %v1194_v4  ;;  %v3080_v44 = vpop.f32.mrb[54].mxu1  ;;  %v1385_v52 = vsub.f32 %v2128_v19, %v937_v9  ;;  %v2129_v15 = vld [vmem:[#allocation7 + $0x90] sm:$0xff] }
 0x1ce   : > { %v2002_v17 = vpop.eup %2001  ;;  %v1448_v31 = vmul.f32 %v2000_v26, %v1384_v39  ;;  %2017 = vpow2.f32 %v1702_v50  ;;  %v3085_v33 = vpop.f32.mrb[55].mxu0  ;;  %v1354_v1 = vsub.f32 %v2129_v15, %v906_v24  ;;  %v3093_v39 = vadd.f32 %v2897_v13, %v2581_v38 }
 0x1cf   : > { %v3087_v12 = vpop.f32.mrb[55].mxu1  ;;  %v2004_v53 = vpop.eup %2003  ;;  %v1480_v41 = vadd.f32 %v1416_v56, %v904_v21  ;;  %v1163_v57 = vadd.f32 1.0, %v2002_v17  ;;  %2019 = vpow2.f32 %v1734_v63  ;;  %v1735_v21 = vmul.f32 -1.442695, %v832_v36 }
 0x1d0   : > { %v2006_v40 = vpop.eup %2005  ;;  %v1512_v49 = vadd.f32 %v1448_v31, %v936_v61  ;;  %v1195_v16 = vadd.f32 1.0, %v2004_v53  ;;  %v3095_v4 = vpop.f32.mrb[56].mxu0  ;;  %v3101_v63 = vadd.f32 %v2899_v43, %v2581_v38  ;;  %v646_v56 = vadd.f32 %v2996_v23, %v2567_v11  ;;  %v2130_v31 = vld [vmem:[#allocation7 + $0x190] sm:$0xff] }
 0x1d1   : > { %v2008_v34 = vpop.eup %2007  ;;  %1544 = vst [vmem:[#allocation7 + $0x80] sm:$0xff] %v1480_v41  ;;  %v1417_v50 = vmul.f32 %v2006_v40, %v1353_v37  ;;  %2021 = vrcp.f32 %v1163_v57  ;;  %v3097_v55 = vpop.f32.mrb[56].mxu1  ;;  %v1386_v32 = vsub.f32 %v2130_v31, %v938_v2  ;;  %v3115_v37 = vadd.f32 %v2915_v54, %v2581_v38 }
 0x1d2   : > { %v2010_v61 = vpop.eup %2009  ;;  %1576 = vst [vmem:[#allocation7 + $0x180] sm:$0xff] %v1512_v49  ;;  %2023 = vrcp.f32 %v1195_v16  ;;  %v1164_v26 = vadd.f32 1.0, %v2008_v34  ;;  %v3105_v42 = vpop.f32.mrb[57].mxu0  ;;  %v1704_v23 = vmul.f32 -1.442695, %v646_v56  ;;  %v838_v53 = vadd.f32 %v2998_v30, %v2567_v11 }
 0x1d3   : > { %v3107_v13 = vpop.f32.mrb[57].mxu1  ;;  %v1481_v36 = vadd.f32 %v1417_v50, %v905_v7  ;;  %v1449_v17 = vmul.f32 %v2010_v61, %v1385_v52  ;;  %2025 = vpow2.f32 %v1703_v6  ;;  %v2012_v43 = vpop.eup %2011  ;;  %v907_v54 = vmax.f32 %v3093_v39, 0.0 }
 0x1d4   : > { %2027 = vrcp.f32 %v1164_v26  ;;  %v1196_v7 = vadd.f32 1.0, %v2012_v43  ;;  %v3123_v57 = vpop.f32.mrb[58].mxu0  ;;  %v3125_v6 = vpop.f32.mrb[58].mxu1  ;;  %v939_v49 = vmax.f32 %v3101_v63, 0.0  ;;  %v1736_v19 = vmul.f32 -1.442695, %v838_v53 }
 0x1d5   : > { %1545 = vst [vmem:[#allocation7 + $0x88] sm:$0xff] %v1481_v36  ;;  %v1513_v41 = vadd.f32 %v1449_v17, %v937_v9  ;;  %2029 = vpow2.f32 %v1735_v21  ;;  %v3129_v30 = vpop.f32.mrb[59].mxu0  ;;  %v3131_v9 = vpop.f32.mrb[59].mxu1  ;;  %v3135_v15 = vadd.f32 %v2939_v20, %v2581_v38  ;;  %v652_v16 = vadd.f32 %v3013_v18, %v2567_v11  ;;  %v2131_v17 = vld [vmem:[#allocation7 + $0x98] sm:$0xff] }
 0x1d6   : > { %v2014_v40 = vpop.eup %2013  ;;  %2031 = vpow2.f32 %v1704_v23  ;;  %v908_v39 = vmax.f32 %v3115_v37, 0.0  ;;  %v844_v21 = vadd.f32 %v3015_v0, %v2567_v11  ;;  %v940_v63 = vmax.f32 %v3121_v28, 0.0 }
 0x1d7   : > { %v2016_v52 = vpop.eup %2015  ;;  %1577 = vst [vmem:[#allocation7 + $0x188] sm:$0xff] %v1513_v41  ;;  %v1418_v35 = vmul.f32 %v2014_v40, %v1354_v1  ;;  %2033 = vrcp.f32 %v1196_v7  ;;  %v1705_v20 = vmul.f32 -1.442695, %v652_v16  ;;  %v1355_v31 = vsub.f32 %v2131_v17, %v907_v54 }
 0x1d8   : > { %v2018_v34 = vpop.eup %2017  ;;  %v1450_v50 = vmul.f32 %v2016_v52, %v1386_v32  ;;  %2035 = vpow2.f32 %v1736_v19  ;;  %v3145_v56 = vpop.f32.mrb[60].mxu0  ;;  %v1737_v43 = vmul.f32 -1.442695, %v844_v21  ;;  %v909_v53 = vmax.f32 %v3135_v15, 0.0 }
 0x1d9   : > { %v2020_v61 = vpop.eup %2019  ;;  %v1482_v1 = vadd.f32 %v1418_v35, %v906_v24  ;;  %v1165_v26 = vadd.f32 1.0, %v2018_v34  ;;  %v3147_v36 = vpop.f32.mrb[60].mxu1  ;;  %v2132_v24 = vld [vmem:[#allocation7 + $0x198] sm:$0xff]  ;;  %v3158_v41 = vadd.f32 %v2941_v8, %v2581_v38  ;;  %v658_v7 = vadd.f32 %v3038_v22, %v2567_v11  ;;  %v2133_v35 = vld [vmem:[#allocation7 + $0xa0] sm:$0xff] }
 0x1da   : > { %v1514_v18 = vadd.f32 %v1450_v50, %v938_v2  ;;  %v1197_v32 = vadd.f32 1.0, %v2020_v61  ;;  %v3151_v0 = vpop.f32.mrb[61].mxu0  ;;  %v3153_v37 = vpop.f32.mrb[61].mxu1  ;;  %v1387_v23 = vsub.f32 %v2132_v24, %v939_v49  ;;  %v850_v40 = vadd.f32 %v3040_v48, %v2567_v11  ;;  %v2134_v34 = vld [vmem:[#allocation7 + $0x1a0] sm:$0xff] }
 0x1db   : > { %v2022_v10 = vpop.eup %2021  ;;  %1546 = vst [vmem:[#allocation7 + $0x90] sm:$0xff] %v1482_v1  ;;  %2037 = vrcp.f32 %v1165_v26  ;;  %v1356_v16 = vsub.f32 %v2133_v35, %v908_v39  ;;  %v1388_v8 = vsub.f32 %v2134_v34, %v940_v63  ;;  %v1706_v22 = vmul.f32 -1.442695, %v658_v7  ;;  %v2136_v34 = vld [vmem:[#allocation7 + $0x1a8] sm:$0xff] }
 0x1dc   : > { %v2024_v29 = vpop.eup %2023  ;;  %1578 = vst [vmem:[#allocation7 + $0x190] sm:$0xff] %v1514_v18  ;;  %v1419_v2 = vmul.f32 %v2022_v10, %v1355_v31  ;;  %2039 = vrcp.f32 %v1197_v32  ;;  %v3166_v50 = vpop.f32.mrb[62].mxu0  ;;  %v2135_v10 = vld [vmem:[#allocation7 + $0xa8] sm:$0xff]  ;;  %v941_v24 = vmax.f32 %v3158_v41, 0.0  ;;  %v3187_v35 = vadd.f32 %v2988_v60, %v2581_v38 }
 0x1dd   : > { %v2026_v19 = vpop.eup %2025  ;;  %v1451_v52 = vmul.f32 %v2024_v29, %v1387_v23  ;;  %2041 = vpow2.f32 %v1705_v20  ;;  %v3168_v21 = vpop.f32.mrb[62].mxu1  ;;  %v1357_v20 = vsub.f32 %v2135_v10, %v909_v53  ;;  %v1738_v29 = vmul.f32 -1.442695, %v850_v40 }
 0x1de   : > { %v2028_v61 = vpop.eup %2027  ;;  %v1483_v1 = vadd.f32 %v1419_v2, %v907_v54  ;;  %v1166_v26 = vadd.f32 1.0, %v2026_v19  ;;  %2043 = vpow2.f32 %v1737_v43  ;;  %v3170_v18 = vpop.f32.mrb[63].mxu0  ;;  %v3179_v54 = vadd.f32 %v2967_v62, %v2581_v38 }
 0x1df   : > { %v3172_v48 = vpop.f32.mrb[63].mxu1  ;;  %v2030_v17 = vpop.eup %2029  ;;  %v1515_v31 = vadd.f32 %v1451_v52, %v939_v49  ;;  %v1420_v32 = vmul.f32 %v2028_v61, %v1356_v16  ;;  %v3183_v49 = vadd.f32 %v2969_v51, %v2581_v38  ;;  %v664_v62 = vadd.f32 %v3066_v45, %v2567_v11 }
 0x1e0   : > { %v2032_v23 = vpop.eup %2031  ;;  %1547 = vst [vmem:[#allocation7 + $0x98] sm:$0xff] %v1483_v1  ;;  %2045 = vrcp.f32 %v1166_v26  ;;  %v1198_v43 = vadd.f32 1.0, %v2030_v17  ;;  %v856_v40 = vadd.f32 %v3068_v27, %v2567_v11  ;;  %v910_v45 = vmax.f32 %v3179_v54, 0.0 }
 0x1e1   : > { %v2034_v2 = vpop.eup %2033  ;;  %1579 = vst [vmem:[#allocation7 + $0x198] sm:$0xff] %v1515_v31  ;;  %v1484_v7 = vadd.f32 %v1420_v32, %v908_v39  ;;  %v1167_v19 = vadd.f32 1.0, %v2032_v23  ;;  %2047 = vpow2.f32 %v1706_v22  ;;  %v3193_v39 = vadd.f32 %v2990_v58, %v2581_v38 }
 0x1e2   : > { %v2036_v52 = vpop.eup %2035  ;;  %v1452_v41 = vmul.f32 %v2034_v2, %v1388_v8  ;;  %2049 = vrcp.f32 %v1198_v43  ;;  %v1389_v8 = vsub.f32 %v2136_v34, %v941_v24  ;;  %v1707_v60 = vmul.f32 -1.442695, %v664_v62 }
 0x1e3   : > { %1548 = vst [vmem:[#allocation7 + $0xa0] sm:$0xff] %v1484_v7  ;;  %2051 = vrcp.f32 %v1167_v19  ;;  %v1199_v51 = vadd.f32 1.0, %v2036_v52  ;;  %v942_v1 = vmax.f32 %v3183_v49, 0.0  ;;  %v1739_v58 = vmul.f32 -1.442695, %v856_v40  ;;  %v2138_v52 = vld [vmem:[#allocation7 + $0x1b0] sm:$0xff] }
 0x1e4   : > { %v1516_v16 = vadd.f32 %v1452_v41, %v940_v63  ;;  %2053 = vpow2.f32 %v1738_v29  ;;  %v911_v17 = vmax.f32 %v3187_v35, 0.0  ;;  %v670_v27 = vadd.f32 %v3085_v33, %v2567_v11  ;;  %v2137_v33 = vld [vmem:[#allocation7 + $0xb0] sm:$0xff] }
 0x1e5   : > { %v2038_v61 = vpop.eup %2037  ;;  %2055 = vrcp.f32 %v1199_v51  ;;  %v943_v31 = vmax.f32 %v3193_v39, 0.0  ;;  %v862_v32 = vadd.f32 %v3087_v12, %v2567_v11  ;;  %v1358_v2 = vsub.f32 %v2137_v33, %v910_v45  ;;  %v2139_v12 = vld [vmem:[#allocation7 + $0xb8] sm:$0xff]  ;;  %v2141_v33 = vld [vmem:[#allocation7 + $0xc0] sm:$0xff] }
 0x1e6   : > { %v2040_v26 = vpop.eup %2039  ;;  %1580 = vst [vmem:[#allocation7 + $0x1a0] sm:$0xff] %v1516_v16  ;;  %v1421_v22 = vmul.f32 %v2038_v61, %v1357_v20  ;;  %2057 = vpow2.f32 %v1707_v60  ;;  %v3211_v20 = vadd.f32 %v3005_v5, %v2581_v38  ;;  %v1708_v43 = vmul.f32 -1.442695, %v670_v27  ;;  %v2140_v51 = vld [vmem:[#allocation7 + $0x1b8] sm:$0xff] }
 0x1e7   : > { %v2042_v28 = vpop.eup %2041  ;;  %v1453_v63 = vmul.f32 %v2040_v26, %v1389_v8  ;;  %2059 = vpow2.f32 %v1739_v58  ;;  %v1740_v49 = vmul.f32 -1.442695, %v862_v32  ;;  %v1390_v41 = vsub.f32 %v2138_v52, %v942_v1 }
 0x1e8   : > { %v2044_v10 = vpop.eup %2043  ;;  %v1485_v23 = vadd.f32 %v1421_v22, %v909_v53  ;;  %v1168_v54 = vadd.f32 1.0, %v2042_v28  ;;  %v1359_v35 = vsub.f32 %v2139_v12, %v911_v17  ;;  %v3215_v15 = vadd.f32 %v3007_v46, %v2581_v38 }
 0x1e9   : > { %v1517_v29 = vadd.f32 %v1453_v63, %v941_v24  ;;  %v1200_v7 = vadd.f32 1.0, %v2044_v10  ;;  %v676_v24 = vadd.f32 %v3105_v42, %v2567_v11  ;;  %v868_v62 = vadd.f32 %v3107_v13, %v2567_v11 }
 0x1ea   : > { %v2046_v19 = vpop.eup %2045  ;;  %1549 = vst [vmem:[#allocation7 + $0xa8] sm:$0xff] %v1485_v23  ;;  %2061 = vrcp.f32 %v1168_v54  ;;  %v1391_v40 = vsub.f32 %v2140_v51, %v943_v31  ;;  %v912_v16 = vmax.f32 %v3211_v20, 0.0  ;;  %v944_v22 = vmax.f32 %v3215_v15, 0.0 }
 0x1eb   : > { %v2048_v5 = vpop.eup %2047  ;;  %1581 = vst [vmem:[#allocation7 + $0x1a8] sm:$0xff] %v1517_v29  ;;  %v1422_v53 = vmul.f32 %v2046_v19, %v1358_v2  ;;  %2063 = vrcp.f32 %v1200_v7  ;;  %v1709_v61 = vmul.f32 -1.442695, %v676_v24  ;;  %v3225_v42 = vadd.f32 %v3031_v25, %v2581_v38  ;;  %v2142_v19 = vld [vmem:[#allocation7 + $0x1c0] sm:$0xff] }
 0x1ec   : > { %v2050_v39 = vpop.eup %2049  ;;  %v1169_v34 = vadd.f32 1.0, %v2048_v5  ;;  %2065 = vpow2.f32 %v1708_v43  ;;  %v1741_v63 = vmul.f32 -1.442695, %v868_v62  ;;  %v3229_v23 = vadd.f32 %v3033_v3, %v2581_v38 }
 0x1ed   : > { %v2052_v46 = vpop.eup %2051  ;;  %v1486_v8 = vadd.f32 %v1422_v53, %v910_v45  ;;  %v1454_v60 = vmul.f32 %v2050_v39, %v1390_v41  ;;  %2067 = vpow2.f32 %v1740_v49  ;;  %v3233_v20 = vadd.f32 %v3060_v14, %v2581_v38  ;;  %v2143_v53 = vld [vmem:[#allocation7 + $0xc8] sm:$0xff] }
 0x1ee   : > { %v2054_v58 = vpop.eup %2053  ;;  %v1423_v26 = vmul.f32 %v2052_v46, %v1359_v35  ;;  %2069 = vrcp.f32 %v1169_v34  ;;  %v874_v43 = vadd.f32 %v3131_v9, %v2567_v11  ;;  %v913_v29 = vmax.f32 %v3225_v42, 0.0  ;;  %v2145_v42 = vld [vmem:[#allocation7 + $0xd0] sm:$0xff] }
 0x1ef   : > { %v2056_v13 = vpop.eup %2055  ;;  %1550 = vst [vmem:[#allocation7 + $0xb0] sm:$0xff] %v1486_v8  ;;  %v1518_v27 = vadd.f32 %v1454_v60, %v942_v1  ;;  %v1201_v28 = vadd.f32 1.0, %v2054_v58  ;;  %2071 = vpow2.f32 %v1709_v61  ;;  %v682_v1 = vadd.f32 %v3129_v30, %v2567_v11  ;;  %v2144_v8 = vld [vmem:[#allocation7 + $0x1c8] sm:$0xff] }
 0x1f0   : > { %v2058_v32 = vpop.eup %2057  ;;  %v1487_v45 = vadd.f32 %v1423_v26, %v911_v17  ;;  %v1455_v10 = vmul.f32 %v2056_v13, %v1391_v40  ;;  %v1360_v2 = vsub.f32 %v2141_v33, %v912_v16  ;;  %v1742_v7 = vmul.f32 -1.442695, %v874_v43 }
 0x1f1   : > { %v2060_v25 = vpop.eup %2059  ;;  %1582 = vst [vmem:[#allocation7 + $0x1b0] sm:$0xff] %v1518_v27  ;;  %2073 = vrcp.f32 %v1201_v28  ;;  %v1170_v54 = vadd.f32 1.0, %v2058_v32  ;;  %v1710_v14 = vmul.f32 -1.442695, %v682_v1  ;;  %v1392_v52 = vsub.f32 %v2142_v19, %v944_v22 }
 0x1f2   : > { %1551 = vst [vmem:[#allocation7 + $0xb8] sm:$0xff] %v1487_v45  ;;  %v1519_v17 = vadd.f32 %v1455_v10, %v943_v31  ;;  %v1202_v3 = vadd.f32 1.0, %v2060_v25  ;;  %2075 = vpow2.f32 %v1741_v63  ;;  %v945_v30 = vmax.f32 %v3229_v23, 0.0 }
 0x1f3   : > { %2077 = vrcp.f32 %v1170_v54  ;;  %v3243_v9 = vadd.f32 %v3062_v59, %v2581_v38  ;;  %v914_v12 = vmax.f32 %v3233_v20, 0.0  ;;  %v688_v35 = vadd.f32 %v3151_v0, %v2567_v11  ;;  %v2146_v20 = vld [vmem:[#allocation7 + $0x1d0] sm:$0xff] }
 0x1f4   : > { %v2062_v49 = vpop.eup %2061  ;;  %1583 = vst [vmem:[#allocation7 + $0x1b8] sm:$0xff] %v1519_v17  ;;  %2079 = vrcp.f32 %v1202_v3  ;;  %v1361_v24 = vsub.f32 %v2143_v53, %v913_v29  ;;  %v880_v59 = vadd.f32 %v3153_v37, %v2567_v11  ;;  %v1393_v60 = vsub.f32 %v2144_v8, %v945_v30 }
 0x1f5   : > { %v2064_v31 = vpop.eup %2063  ;;  %v1424_v41 = vmul.f32 %v2062_v49, %v1360_v2  ;;  %2081 = vpow2.f32 %v1710_v14  ;;  %v1711_v40 = vmul.f32 -1.442695, %v688_v35  ;;  %v946_v61 = vmax.f32 %v3243_v9, 0.0 }
 0x1f6   : > { %v2066_v15 = vpop.eup %2065  ;;  %v1456_v5 = vmul.f32 %v2064_v31, %v1392_v52  ;;  %2083 = vpow2.f32 %v1742_v7  ;;  %v1362_v13 = vsub.f32 %v2145_v42, %v914_v12  ;;  %v1743_v27 = vmul.f32 -1.442695, %v880_v59 }
 0x1f7   : > { %v2068_v62 = vpop.eup %2067  ;;  %v1488_v39 = vadd.f32 %v1424_v41, %v912_v16  ;;  %v1171_v51 = vadd.f32 1.0, %v2066_v15  ;;  %v668_v16 = vadd.f32 %v3078_v47, %v2581_v38  ;;  %v860_v32 = vadd.f32 %v3080_v44, %v2581_v38  ;;  %v2148_v41 = vld [vmem:[#allocation7 + $0x1d8] sm:$0xff] }
 0x1f8   : > { %v2070_v34 = vpop.eup %2069  ;;  %v1520_v46 = vadd.f32 %v1456_v5, %v944_v22  ;;  %v1203_v58 = vadd.f32 1.0, %v2068_v62  ;;  %v694_v22 = vadd.f32 %v3170_v18, %v2567_v11  ;;  %v886_v45 = vadd.f32 %v3172_v48, %v2567_v11 }
 0x1f9   : > { %v2072_v0 = vpop.eup %2071  ;;  %1552 = vst [vmem:[#allocation7 + $0xc0] sm:$0xff] %v1488_v39  ;;  %v1425_v26 = vmul.f32 %v2070_v34, %v1361_v24  ;;  %2085 = vrcp.f32 %v1171_v51  ;;  %v1394_v25 = vsub.f32 %v2146_v20, %v946_v61  ;;  %v674_v18 = vadd.f32 %v3095_v4, %v2581_v38  ;;  %v2149_v39 = vld [vmem:[#allocation7 + $0xe0] sm:$0xff]  ;;  %v2152_v20 = vld [vmem:[#allocation7 + $0x1e8] sm:$0xff] }
 0x1fa   : > { %1584 = vst [vmem:[#allocation7 + $0x1c0] sm:$0xff] %v1520_v46  ;;  %2087 = vrcp.f32 %v1203_v58  ;;  %v1172_v37 = vadd.f32 1.0, %v2072_v0  ;;  %v1712_v47 = vmul.f32 -1.442695, %v694_v22  ;;  %v1744_v43 = vmul.f32 -1.442695, %v886_v45 }
 0x1fb   : > { %v2074_v28 = vpop.eup %2073  ;;  %v1489_v63 = vadd.f32 %v1425_v26, %v913_v29  ;;  %2089 = vpow2.f32 %v1711_v40  ;;  %v915_v3 = vmax.f32 %v668_v16, 0.0  ;;  %v947_v33 = vmax.f32 %v860_v32, 0.0 }
 0x1fc   : > { %v2076_v10 = vpop.eup %2075  ;;  %v1457_v23 = vmul.f32 %v2074_v28, %v1393_v60  ;;  %2091 = vrcp.f32 %v1172_v37  ;;  %v866_v7 = vadd.f32 %v3097_v55, %v2581_v38  ;;  %v916_v19 = vmax.f32 %v674_v18, 0.0  ;;  %v2151_v28 = vld [vmem:[#allocation7 + $0xe8] sm:$0xff] }
 0x1fd   : > { %v2078_v54 = vpop.eup %2077  ;;  %1553 = vst [vmem:[#allocation7 + $0xc8] sm:$0xff] %v1489_v63  ;;  %v1204_v1 = vadd.f32 1.0, %v2076_v10  ;;  %2093 = vpow2.f32 %v1743_v27  ;;  %v1395_v35 = vsub.f32 %v2148_v41, %v947_v33  ;;  %v680_v15 = vadd.f32 %v3123_v57, %v2581_v38  ;;  %v2150_v57 = vld [vmem:[#allocation7 + $0x1e0] sm:$0xff] }
 0x1fe   : > { %v2080_v17 = vpop.eup %2079  ;;  %v1521_v44 = vadd.f32 %v1457_v23, %v945_v30  ;;  %v1426_v29 = vmul.f32 %v2078_v54, %v1362_v13  ;;  %2095 = vpow2.f32 %v1712_v47  ;;  %v2147_v30 = vld [vmem:[#allocation7 + $0xd8] sm:$0xff]  ;;  %v948_v55 = vmax.f32 %v866_v7, 0.0 }
 0x1ff   : > { %v2082_v11 = vpop.eup %2081  ;;  %v1458_v48 = vmul.f32 %v2080_v17, %v1394_v25  ;;  %2097 = vrcp.f32 %v1204_v1  ;;  %v1363_v9 = vsub.f32 %v2147_v30, %v915_v3  ;;  %v872_v53 = vadd.f32 %v3125_v6, %v2581_v38 }
 0x200   : > { %v2084_v2 = vpop.eup %2083  ;;  %1585 = vst [vmem:[#allocation7 + $0x1c8] sm:$0xff] %v1521_v44  ;;  %v1490_v14 = vadd.f32 %v1426_v29, %v914_v12  ;;  %v1173_v49 = vadd.f32 1.0, %v2082_v11  ;;  %2099 = vpow2.f32 %v1744_v43  ;;  %v1364_v51 = vsub.f32 %v2149_v39, %v916_v19 }
 0x201   : > { %v1522_v4 = vadd.f32 %v1458_v48, %v946_v61  ;;  %v1205_v52 = vadd.f32 1.0, %v2084_v2  ;;  %v917_v61 = vmax.f32 %v680_v15, 0.0  ;;  %v1396_v0 = vsub.f32 %v2150_v57, %v948_v55 }
 0x202   : > { %1554 = vst [vmem:[#allocation7 + $0xd0] sm:$0xff] %v1490_v14  ;;  %2101 = vrcp.f32 %v1173_v49  ;;  %v949_v26 = vmax.f32 %v872_v53, 0.0  ;;  %v686_v27 = vadd.f32 %v3145_v56, %v2581_v38  ;;  %v878_v32 = vadd.f32 %v3147_v36, %v2581_v38  ;;  %v2155_v49 = vld [vmem:[#allocation7 + $0xf8] sm:$0xff] }
 0x203   : > { %v2086_v31 = vpop.eup %2085  ;;  %1586 = vst [vmem:[#allocation7 + $0x1d0] sm:$0xff] %v1522_v4  ;;  %2103 = vrcp.f32 %v1205_v52  ;;  %v1365_v63 = vsub.f32 %v2151_v28, %v917_v61  ;;  %v692_v47 = vadd.f32 %v3166_v50, %v2581_v38  ;;  %v884_v43 = vadd.f32 %v3168_v21, %v2581_v38  ;;  %v2154_v50 = vld [vmem:[#allocation7 + $0x1f0] sm:$0xff]  ;;  %v2156_v21 = vld [vmem:[#allocation7 + $0x1f8] sm:$0xff] }
 0x204   : > { %v2088_v12 = vpop.eup %2087  ;;  %v1427_v5 = vmul.f32 %v2086_v31, %v1363_v9  ;;  %v1397_v25 = vsub.f32 %v2152_v20, %v949_v26  ;;  %v918_v18 = vmax.f32 %v686_v27, 0.0  ;;  %v950_v36 = vmax.f32 %v878_v32, 0.0 }
 0x205   : > { %v2090_v24 = vpop.eup %2089  ;;  %v1459_v62 = vmul.f32 %v2088_v12, %v1395_v35  ;;  %v919_v29 = vmax.f32 %v692_v47, 0.0 }
 0x206   : > { %v2092_v40 = vpop.eup %2091  ;;  %v1491_v59 = vadd.f32 %v1427_v5, %v915_v3  ;;  %v1174_v34 = vadd.f32 1.0, %v2090_v24  ;;  %v2153_v3 = vld [vmem:[#allocation7 + $0xf0] sm:$0xff]  ;;  %v1398_v2 = vsub.f32 %v2154_v50, %v950_v36 }
 0x207   : > { %v2094_v46 = vpop.eup %2093  ;;  %v1523_v8 = vadd.f32 %v1459_v62, %v947_v33  ;;  %v1428_v60 = vmul.f32 %v2092_v40, %v1364_v51  ;;  %v1366_v11 = vsub.f32 %v2153_v3, %v918_v18  ;;  %v951_v33 = vmax.f32 %v884_v43, 0.0 }
 0x208   : > { %v2096_v58 = vpop.eup %2095  ;;  %1555 = vst [vmem:[#allocation7 + $0xd8] sm:$0xff] %v1491_v59  ;;  %2105 = vrcp.f32 %v1174_v34  ;;  %v1206_v42 = vadd.f32 1.0, %v2094_v46  ;;  %v1367_v4 = vsub.f32 %v2155_v49, %v919_v29 }
 0x209   : > { %v2098_v13 = vpop.eup %2097  ;;  %1587 = vst [vmem:[#allocation7 + $0x1d8] sm:$0xff] %v1523_v8  ;;  %v1492_v6 = vadd.f32 %v1428_v60, %v916_v19  ;;  %v1175_v16 = vadd.f32 1.0, %v2096_v58  ;;  %v1399_v30 = vsub.f32 %v2156_v21, %v951_v33 }
 0x20a   : > { %v2100_v37 = vpop.eup %2099  ;;  %v1460_v22 = vmul.f32 %v2098_v13, %v1396_v0  ;;  %2107 = vrcp.f32 %v1206_v42 }
 0x20b   : > { %1556 = vst [vmem:[#allocation7 + $0xe0] sm:$0xff] %v1492_v6  ;;  %2109 = vrcp.f32 %v1175_v16  ;;  %v1207_v45 = vadd.f32 1.0, %v2100_v37 }
 0x20c   : > { %v2102_v10 = vpop.eup %2101  ;;  %v1524_v23 = vadd.f32 %v1460_v22, %v948_v55 }
 0x20d   : > { %v2104_v56 = vpop.eup %2103  ;;  %v1429_v54 = vmul.f32 %v2102_v10, %v1365_v63  ;;  %2111 = vrcp.f32 %v1207_v45 }
 0x20e   : > { %1588 = vst [vmem:[#allocation7 + $0x1e0] sm:$0xff] %v1524_v23  ;;  %v1461_v1 = vmul.f32 %v2104_v56, %v1397_v25 }
 0x20f   : > { %v1493_v17 = vadd.f32 %v1429_v54, %v917_v61 }
 0x210   : > { %v1525_v44 = vadd.f32 %v1461_v1, %v949_v26 }
 0x211   : > { %1557 = vst [vmem:[#allocation7 + $0xe8] sm:$0xff] %v1493_v17 }
 0x212   : > { %v2106_v48 = vpop.eup %2105  ;;  %1589 = vst [vmem:[#allocation7 + $0x1e8] sm:$0xff] %v1525_v44 }
 0x213   : > { %v1430_v14 = vmul.f32 %v2106_v48, %v1366_v11 }
 0x214   : > { %v2108_v7 = vpop.eup %2107 }
 0x215   : > { %v2110_v19 = vpop.eup %2109  ;;  %v1494_v52 = vadd.f32 %v1430_v14, %v918_v18  ;;  %v1462_v38 = vmul.f32 %v2108_v7, %v1398_v2 }
 0x216   : > { %v1431_v9 = vmul.f32 %v2110_v19, %v1367_v4 }
 0x217   : > { %v2112_v31 = vpop.eup %2111  ;;  %1558 = vst [vmem:[#allocation7 + $0xf0] sm:$0xff] %v1494_v52  ;;  %v1526_v41 = vadd.f32 %v1462_v38, %v950_v36 }
 0x218   : > { %v1495_v35 = vadd.f32 %v1431_v9, %v919_v29  ;;  %v1463_v15 = vmul.f32 %v2112_v31, %v1399_v30 }
 0x219   : > { %1590 = vst [vmem:[#allocation7 + $0x1f0] sm:$0xff] %v1526_v41 }
 0x21a   : > { %1559 = vst [vmem:[#allocation7 + $0xf8] sm:$0xff] %v1495_v35  ;;  %v1527_v12 = vadd.f32 %v1463_v15, %v951_v33 }
 0x21c   : > { %1591 = vst [vmem:[#allocation7 + $0x1f8] sm:$0xff] %v1527_v12 }
 0x21d   : > { %2226 = shalt.err (!%p2223_p0)
}
 0x21e   : > { %s2227_s9 = scalar_lea.hbm %s3315_s3, 8192 }
 0x21f   : > { %p2228_p1 = scmp.ne.s32.totalorder %s3315_s3, %s2227_s9  ;;  %p2233_p7 = scmp.lt.u32.totalorder %s2227_s9, %s3315_s3 }
 0x221   : > { %p2229_p2 = pnand %p2228_p1, %p3277_p6 }
 0x223   : > { %p2230_p5 = pneg %p2229_p2 }
 0x225   : > { %p2235_p8 = pnand %p2233_p7, %p2230_p5 }
 0x227   : > { %2238 = shalt.err (!%p2235_p8)
}
 0x228   : > { %s2283_s24 = smov 128   ;;  %s2284_s25 = smov 8  }
 0x229   : > { %1807 = dma.vmem_to_hbm [thread:$0]  (%p3277_p6), %s1602_s5, 8192, %s3315_s3, [#allocation4], %s2283_s24, %s2283_s24, %s2284_s25  }
 0x22a   : > { %2260 = dma.done.wait (%p3277_p6), [#allocation4], 8192  }
 0x22b   : > { %2262 = vsyncadd (%p3277_p6), [#allocation4], 4294959104 }
 0x22c PF: > { %s16_s14 = sadd.s32 1, %s2273_s14   ;;  %s3325_s12 = smov %s2269_s13 }
 0x22d   : > { %p13_p3 = scmp.ge.s32.totalorder %s16_s14, 5   ;;  %s3326_s13 = smov %s3328_s16 }
 0x22f   :  { %15 = sbr.rel (!%p13_p3) target bundleno = 4 (0x4), region = 73 }
 0x236   :  { %1617 = vsyncpa [#allocation3], 1 }
 0x237   :  { %1619 = vsyncpa [#allocation3 + $0x1], 1 }
 0x238   :  { %1620 = vsyncpa [#allocation6], 1 }
 0x239   :  { %1621 = vsyncpa [#allocation4], 1 }
 0x23a   :  { %1623 = vsyncpa [#allocation4 + $0x1], 1 }

</bundles_post_ra>
